<compile_context>
chip_gen: v5e
topology: v5e:2x2
jax: 0.10.0
libtpu: 0.0.40
codegen_flags: <defaults>
</compile_context>

<pallas_src>
import jax
import jax.numpy as jnp
from jax.experimental import pallas as pl
from jax.experimental.pallas import tpu as pltpu

LANE = 128                         # vreg lane width; all feature dims padded to this
COMPUTE_DTYPE = jnp.bfloat16       # MXU operand dtype (jnp.float32 to validate numerics)
_CDT_BYTES = jnp.dtype(COMPUTE_DTYPE).itemsize


def _round_up(v, m):
    return (v + m - 1) // m * m


def _pick_block_rows(n_pad):
    for tm in (512, 256, 128):
        if n_pad % tm == 0:
            return tm
    return n_pad


# ----------------------------------------------------------------- kernel ---

def _make_layer_kernel(*, fuse_encoder, fuse_decoder, has_residual, block_rows):
    """One GCNConv over a row block, optionally fused with lin_enc / skip+lin_dec.

    Static Python flags resolve the ref list and dead branches at trace time.
      inputs : adj_blk(TM,n_pad), h_full(n_pad,LANE), conv_wT, conv_b,
               [enc_wT, enc_b]          if fuse_encoder
               [x0_blk]                 if fuse_decoder and not fuse_encoder
               [dec_wT, dec_b]          if fuse_decoder
      outputs: y_blk(TM,LANE) [, x0_blk(TM,LANE) if fuse_encoder and not fuse_decoder]
    """
    cdt = COMPUTE_DTYPE

    def kernel(*refs):
        it = iter(refs)
        adj_ref = next(it)                  # (TM, n_pad)   compute dtype, streamed
        h_ref = next(it)                    # (n_pad, LANE) f32, resident (constant map)
        w_ref = next(it)                    # (LANE, LANE)  compute dtype, resident
        b_ref = next(it)                    # (1, LANE)     f32, resident
        enc_w_ref = enc_b_ref = None
        x0_in_ref = dec_w_ref = dec_b_ref = None
        if fuse_encoder:
            enc_w_ref = next(it)
            enc_b_ref = next(it)
        if fuse_decoder:
            if not fuse_encoder:
                x0_in_ref = next(it)        # (TM, LANE) f32, streamed row block
            dec_w_ref = next(it)
            dec_b_ref = next(it)
        out_ref = next(it)                  # (TM, LANE) f32
        x0_out_ref = next(it) if (fuse_encoder and not fuse_decoder) else None

        i = pl.program_id(0)
        row0 = pl.multiple_of(i * block_rows, block_rows)

        # --- GCNConv(normalize=False): y = relu(A[blk] @ h @ W^T + b) --------
        # (A_blk @ h) @ W^T: the padded W^T multiply touches only this block.
        agg = jnp.dot(adj_ref[...], h_ref[...].astype(cdt),
                      preferred_element_type=jnp.float32)
        y = jnp.dot(agg.astype(cdt), w_ref[...],
                    preferred_element_type=jnp.float32)
        y = jnp.maximum(y + b_ref[...], 0.0)            # bias + ReLU in f32
        if has_residual:                                # x += _x when C_in == C_out
            y = y + h_ref[pl.ds(row0, block_rows), :]

        # --- fused encoder: x0 = relu(lin_enc(x)) -----------------------------
        x0_blk = None
        if fuse_encoder:
            x_blk = h_ref[pl.ds(row0, block_rows), :]
            x0_blk = jnp.maximum(
                jnp.dot(x_blk.astype(cdt), enc_w_ref[...],
                        preferred_element_type=jnp.float32) + enc_b_ref[...],
                0.0)
            if x0_out_ref is not None:
                x0_out_ref[...] = x0_blk

        # --- fused tail: x += x0 ; lin_dec ; sigmoid --------------------------
        if fuse_decoder:
            if x0_blk is None:
                x0_blk = x0_in_ref[...]
            z = jnp.dot((y + x0_blk).astype(cdt), dec_w_ref[...],
                        preferred_element_type=jnp.float32) + dec_b_ref[...]
            out_ref[...] = jax.nn.sigmoid(z)            # EUP slot
        else:
            out_ref[...] = y

    return kernel


def _build_layer_call(*, n_pad, tm, fuse_encoder, fuse_decoder, has_residual):
    grid = (n_pad // tm,)
    adj_spec = pl.BlockSpec((tm, n_pad), lambda i: (i, 0))       # streamed row blocks
    full_spec = pl.BlockSpec((n_pad, LANE), lambda i: (0, 0))    # resident activations
    w_spec = pl.BlockSpec((LANE, LANE), lambda i: (0, 0))        # resident weights
    b_spec = pl.BlockSpec((1, LANE), lambda i: (0, 0))           # resident bias
    row_spec = pl.BlockSpec((tm, LANE), lambda i: (i, 0))        # streamed row blocks

    in_specs = [adj_spec, full_spec, w_spec, b_spec]
    if fuse_encoder:
        in_specs += [w_spec, b_spec]
    if fuse_decoder:
        if not fuse_encoder:
            in_specs += [row_spec]
        in_specs += [w_spec, b_spec]

    if fuse_encoder and not fuse_decoder:
        out_shape = (jax.ShapeDtypeStruct((n_pad, LANE), jnp.float32),
                     jax.ShapeDtypeStruct((n_pad, LANE), jnp.float32))
        out_specs = (row_spec, row_spec)
    else:
        out_shape = jax.ShapeDtypeStruct((n_pad, LANE), jnp.float32)
        out_specs = row_spec

    # VMEM working set: double-buffered adj blocks + resident h/weights + row IO.
    need = (2 * tm * n_pad * _CDT_BYTES          # adj row blocks (x2 buffers)
            + n_pad * LANE * 4                   # resident previous activations
            + 8 * LANE * LANE * _CDT_BYTES       # weight slabs
            + 8 * tm * LANE * 4)                 # x0/out row blocks (x2 buffers)
    vmem_limit = int(min(max(2 * need + (4 << 20), 32 << 20), 64 << 20))

    kernel = _make_layer_kernel(fuse_encoder=fuse_encoder, fuse_decoder=fuse_decoder,
                                has_residual=has_residual, block_rows=tm)
    return pl.pallas_call(
        kernel,
        grid=grid,
        in_specs=in_specs,
        out_specs=out_specs,
        out_shape=out_shape,
        compiler_params=pltpu.CompilerParams(
            dimension_semantics=("parallel",),   # v7x: shard row blocks over 2 TCs
            vmem_limit_bytes=vmem_limit),
    )


# ----------------------------------------------------------------- params ---

def init_gcn_params(key, in_channels, hidden_channels, out_channels, num_layers):
    """Deterministic synthetic parameters.

    PyTorch Linear weights are (out, in); stored here ALREADY transposed (W^T),
    zero-padded to (LANE, LANE), and cast to the MXU compute dtype.  Biases are
    (1, LANE) f32 (elementwise math stays f32 for the v5e VPU).
    """
    keys = jax.random.split(key, 2 * num_layers + 4)
    ki = iter(keys)

    def lin_w(k, out_c, in_c):
        return 0.1 * jax.random.normal(k, (out_c, in_c), jnp.float32)

    def lin_b(k, out_c):
        return 0.1 * jax.random.normal(k, (out_c,), jnp.float32)

    def pad_wt(w):
        out_c, in_c = w.shape
        return (jnp.zeros((LANE, LANE), jnp.float32)
                .at[:in_c, :out_c].set(w.T).astype(COMPUTE_DTYPE))

    def pad_b(b):
        return jnp.zeros((1, LANE), jnp.float32).at[0, :b.shape[0]].set(b)

    dims = [in_channels] + [hidden_channels] * (num_layers - 1) + [out_channels]

    convs = []
    for li in range(num_layers):
        w = lin_w(next(ki), dims[li + 1], dims[li])
        b = lin_b(next(ki), dims[li + 1])
        convs.append((pad_wt(w), pad_b(b)))

    enc_w, enc_b = lin_w(next(ki), hidden_channels, in_channels), lin_b(next(ki), hidden_channels)
    dec_w, dec_b = lin_w(next(ki), out_channels, hidden_channels), lin_b(next(ki), out_channels)

    # NOTE: convs[-1] exists in the PyTorch module but is never used in forward
    # (the loop runs over convs[:-1]); kept in params for parity.
    params = {
        "convs": convs,
        "lin_enc": (pad_wt(enc_w), pad_b(enc_b)),
        "lin_dec": (pad_wt(dec_w), pad_b(dec_b)),
    }
    num_convs = num_layers - 1
    meta = {
        "num_convs": num_convs,
        "has_residual": tuple(dims[li] == dims[li + 1] for li in range(num_convs)),
        "out_channels": out_channels,
    }
    return params, meta


# ---------------------------------------------------------------- forward ---

def build_gcn_forward(params, meta, num_nodes):
    """Builds a jitted forward(x, adj_padded) -> (num_nodes, out_channels)."""
    num_convs = meta["num_convs"]
    out_c = meta["out_channels"]
    n_pad = _round_up(num_nodes, LANE)
    tm = _pick_block_rows(n_pad)

    convs = params["convs"][:num_convs]           # convs[-1] unused in forward
    enc_w, enc_b = params["lin_enc"]
    dec_w, dec_b = params["lin_dec"]

    calls = []
    for li in range(num_convs):
        fuse_enc = (li == 0)
        fuse_dec = (li == num_convs - 1)
        call = _build_layer_call(n_pad=n_pad, tm=tm,
                                 fuse_encoder=fuse_enc, fuse_decoder=fuse_dec,
                                 has_residual=meta["has_residual"][li])
        calls.append((call, fuse_enc, fuse_dec, li))

    @jax.jit
    def forward(x, adj_pad):
        adj_pad = adj_pad.astype(COMPUTE_DTYPE)
        # Lane-dense input slab; pad rows stay zero.  (Pad rows later pick up
        # relu(bias) garbage, but A's pad columns are zero and pad rows are
        # sliced off, so real rows are unaffected.)
        h = jnp.pad(x.astype(jnp.float32),
                    ((0, n_pad - x.shape[0]), (0, LANE - x.shape[1])))
        x0 = None
        for call, fuse_enc, fuse_dec, li in calls:
            w_t, b = convs[li]
            args = [adj_pad, h, w_t, b]
            if fuse_enc:
                args += [enc_w, enc_b]
            if fuse_dec:
                if not fuse_enc:
                    args += [x0]
                args += [dec_w, dec_b]
            out = call(*args)
            if fuse_enc and not fuse_dec:
                h, x0 = out
            else:
                h = out
        return h[:num_nodes, :out_c]

    return forward


def edge_index_to_dense_adj(edge_index, num_nodes, padded_nodes=None):
    """A[dst, src] += 1 (multiplicities preserved == PyG scatter-add)."""
    n = padded_nodes if padded_nodes is not None else num_nodes
    adj = jnp.zeros((n, n), jnp.float32)
    adj = adj.at[edge_index[1], edge_index[0]].add(1.0)
    return adj.astype(COMPUTE_DTYPE)   # small-int multiplicities are exact in bf16


# ------------------------------------------------------------------- main ---

if __name__ == "__main__":
    N = 300             # nodes (n_pad = 384 -> 3 row blocks, exercises the grid)
    E = 900             # edges
    IN_C = 8
    HID_C = 32
    OUT_C = 4
    NUM_LAYERS = 3
    DROPOUT = 0.5       # irrelevant in eval mode

    key = jax.random.PRNGKey(0)
    k_x, k_e, k_p = jax.random.split(key, 3)

    x = jax.random.normal(k_x, (N, IN_C), jnp.float32)
    edge_index = jax.random.randint(k_e, (2, E), 0, N, dtype=jnp.int32)

    params, meta = init_gcn_params(k_p, IN_C, HID_C, OUT_C, NUM_LAYERS)

    n_pad = _round_up(N, LANE)
    adj = edge_index_to_dense_adj(edge_index, N, padded_nodes=n_pad)

    forward = build_gcn_forward(params, meta, N)
    out = jax.block_until_ready(forward(x, adj))

    assert out.shape == (N, OUT_C)
    assert bool(jnp.all(jnp.isfinite(out)))
    assert bool(jnp.all((out >= 0.0) & (out <= 1.0)))   # sigmoid output

    print("KERNEL_OK")
</pallas_src>

<mosaic_0001>
module attributes {stable_mosaic.version = 11 : i64} {
  func.func @kernel(%arg0: i32, %arg1: memref<128x384xbf16, #tpu.memory_space<vmem>>, %arg2: memref<384x128xf32, #tpu.memory_space<vmem>>, %arg3: memref<128x128xbf16, #tpu.memory_space<vmem>>, %arg4: memref<1x128xf32, #tpu.memory_space<vmem>>, %arg5: memref<128x128xbf16, #tpu.memory_space<vmem>>, %arg6: memref<1x128xf32, #tpu.memory_space<vmem>>, %arg7: memref<128x128xf32, #tpu.memory_space<vmem>>, %arg8: memref<128x128xf32, #tpu.memory_space<vmem>>) attributes {dimension_semantics = [#tpu.dimension_semantics<parallel>], iteration_bounds = array<i64: 3>, scalar_prefetch = 0 : i64, scratch_operands = 0 : i64, tpu.core_type = #tpu.core_type<tc>, window_params = [{transform_indices = @transform_0, window_bounds = array<i64: 128, 384>}, {pipeline_mode = #tpu.pipeline_mode<synchronous>, transform_indices = @transform_1, window_bounds = array<i64: 384, 128>}, {pipeline_mode = #tpu.pipeline_mode<synchronous>, transform_indices = @transform_2, window_bounds = array<i64: 128, 128>}, {pipeline_mode = #tpu.pipeline_mode<synchronous>, transform_indices = @transform_3, window_bounds = array<i64: 1, 128>}, {pipeline_mode = #tpu.pipeline_mode<synchronous>, transform_indices = @transform_4, window_bounds = array<i64: 128, 128>}, {pipeline_mode = #tpu.pipeline_mode<synchronous>, transform_indices = @transform_5, window_bounds = array<i64: 1, 128>}, {transform_indices = @transform_6, window_bounds = array<i64: 128, 128>}, {transform_indices = @transform_7, window_bounds = array<i64: 128, 128>}]} {
    %c128_i32 = arith.constant 128 : i32
    %0 = arith.muli %arg0, %c128_i32 : i32
    %1 = tpu.assume_multiple %0, 128 : i32
    %c0 = arith.constant 0 : index
    %c0_0 = arith.constant 0 : index
    %2 = vector.load %arg1[%c0, %c0_0] : memref<128x384xbf16, #tpu.memory_space<vmem>>, vector<128x384xbf16>
    %c0_1 = arith.constant 0 : index
    %c0_2 = arith.constant 0 : index
    %3 = vector.load %arg2[%c0_1, %c0_2] : memref<384x128xf32, #tpu.memory_space<vmem>>, vector<384x128xf32>
    %4 = arith.truncf %3 : vector<384x128xf32> to vector<384x128xbf16>
    %cst = arith.constant dense<0.000000e+00> : vector<128x128xf32>
    %5 = tpu.matmul %2, %4, %cst {dimension_numbers = #tpu.dot_dimension_numbers<[1], [0], [0], [1], [0, 0, 1, 1], [], []>} : vector<128x384xbf16>, vector<384x128xbf16>, vector<128x128xf32> -> vector<128x128xf32>
    %6 = arith.truncf %5 : vector<128x128xf32> to vector<128x128xbf16>
    %c0_3 = arith.constant 0 : index
    %c0_4 = arith.constant 0 : index
    %7 = vector.load %arg3[%c0_3, %c0_4] : memref<128x128xbf16, #tpu.memory_space<vmem>>, vector<128x128xbf16>
    %cst_5 = arith.constant dense<0.000000e+00> : vector<128x128xf32>
    %8 = tpu.matmul %6, %7, %cst_5 {dimension_numbers = #tpu.dot_dimension_numbers<[1], [0], [0], [1], [0, 0, 1, 1], [], []>} : vector<128x128xbf16>, vector<128x128xbf16>, vector<128x128xf32> -> vector<128x128xf32>
    %c0_6 = arith.constant 0 : index
    %c0_7 = arith.constant 0 : index
    %9 = vector.load %arg4[%c0_6, %c0_7] : memref<1x128xf32, #tpu.memory_space<vmem>>, vector<1x128xf32>
    %10 = vector.broadcast %9 : vector<1x128xf32> to vector<128x128xf32>
    %11 = arith.addf %8, %10 : vector<128x128xf32>
    %cst_8 = arith.constant 0.000000e+00 : f32
    %12 = vector.broadcast %cst_8 : f32 to vector<128x128xf32>
    %13 = arith.maximumf %11, %12 : vector<128x128xf32>
    %14 = arith.index_cast %1 : i32 to index
    %c0_9 = arith.constant 0 : index
    %15 = vector.load %arg2[%14, %c0_9] : memref<384x128xf32, #tpu.memory_space<vmem>>, vector<128x128xf32>
    %16 = arith.truncf %15 : vector<128x128xf32> to vector<128x128xbf16>
    %c0_10 = arith.constant 0 : index
    %c0_11 = arith.constant 0 : index
    %17 = vector.load %arg5[%c0_10, %c0_11] : memref<128x128xbf16, #tpu.memory_space<vmem>>, vector<128x128xbf16>
    %cst_12 = arith.constant dense<0.000000e+00> : vector<128x128xf32>
    %18 = tpu.matmul %16, %17, %cst_12 {dimension_numbers = #tpu.dot_dimension_numbers<[1], [0], [0], [1], [0, 0, 1, 1], [], []>} : vector<128x128xbf16>, vector<128x128xbf16>, vector<128x128xf32> -> vector<128x128xf32>
    %c0_13 = arith.constant 0 : index
    %c0_14 = arith.constant 0 : index
    %19 = vector.load %arg6[%c0_13, %c0_14] : memref<1x128xf32, #tpu.memory_space<vmem>>, vector<1x128xf32>
    %20 = vector.broadcast %19 : vector<1x128xf32> to vector<128x128xf32>
    %21 = arith.addf %18, %20 : vector<128x128xf32>
    %cst_15 = arith.constant 0.000000e+00 : f32
    %22 = vector.broadcast %cst_15 : f32 to vector<128x128xf32>
    %23 = arith.maximumf %21, %22 : vector<128x128xf32>
    %c0_16 = arith.constant 0 : index
    %c0_17 = arith.constant 0 : index
    %24 = vector.load %arg8[%c0_16, %c0_17] : memref<128x128xf32, #tpu.memory_space<vmem>>, vector<128x128xf32>
    tpu.vector_store %arg8[%c0_16, %c0_17], %23 {strides = array<i32>} : memref<128x128xf32, #tpu.memory_space<vmem>>, vector<128x128xf32>,
    %c0_18 = arith.constant 0 : index
    %c0_19 = arith.constant 0 : index
    %25 = vector.load %arg7[%c0_18, %c0_19] : memref<128x128xf32, #tpu.memory_space<vmem>>, vector<128x128xf32>
    tpu.vector_store %arg7[%c0_18, %c0_19], %13 {strides = array<i32>} : memref<128x128xf32, #tpu.memory_space<vmem>>, vector<128x128xf32>,
    return
  }
  func.func @transform_0(%arg0: i32) -> (i32, i32) {
    %c0_i32 = arith.constant 0 : i32
    %c0_i32_0 = arith.constant 0 : i32
    return %arg0, %c0_i32 : i32, i32
  }
  func.func @transform_1(%arg0: i32) -> (i32, i32) {
    %c0_i32 = arith.constant 0 : i32
    %c0_i32_0 = arith.constant 0 : i32
    %c0_i32_1 = arith.constant 0 : i32
    return %c0_i32, %c0_i32_0 : i32, i32
  }
  func.func @transform_2(%arg0: i32) -> (i32, i32) {
    %c0_i32 = arith.constant 0 : i32
    %c0_i32_0 = arith.constant 0 : i32
    %c0_i32_1 = arith.constant 0 : i32
    return %c0_i32, %c0_i32_0 : i32, i32
  }
  func.func @transform_3(%arg0: i32) -> (i32, i32) {
    %c0_i32 = arith.constant 0 : i32
    %c0_i32_0 = arith.constant 0 : i32
    %c0_i32_1 = arith.constant 0 : i32
    return %c0_i32, %c0_i32_0 : i32, i32
  }
  func.func @transform_4(%arg0: i32) -> (i32, i32) {
    %c0_i32 = arith.constant 0 : i32
    %c0_i32_0 = arith.constant 0 : i32
    %c0_i32_1 = arith.constant 0 : i32
    return %c0_i32, %c0_i32_0 : i32, i32
  }
  func.func @transform_5(%arg0: i32) -> (i32, i32) {
    %c0_i32 = arith.constant 0 : i32
    %c0_i32_0 = arith.constant 0 : i32
    %c0_i32_1 = arith.constant 0 : i32
    return %c0_i32, %c0_i32_0 : i32, i32
  }
  func.func @transform_6(%arg0: i32) -> (i32, i32) {
    %c0_i32 = arith.constant 0 : i32
    %c0_i32_0 = arith.constant 0 : i32
    return %arg0, %c0_i32 : i32, i32
  }
  func.func @transform_7(%arg0: i32) -> (i32, i32) {
    %c0_i32 = arith.constant 0 : i32
    %c0_i32_0 = arith.constant 0 : i32
    return %arg0, %c0_i32 : i32, i32
  }
}

module attributes {stable_mosaic.version = 11 : i64} {
  func.func @kernel(%arg0: i32, %arg1: memref<128x384xbf16, #tpu.memory_space<vmem>>, %arg2: memref<384x128xf32, #tpu.memory_space<vmem>>, %arg3: memref<128x128xbf16, #tpu.memory_space<vmem>>, %arg4: memref<1x128xf32, #tpu.memory_space<vmem>>, %arg5: memref<128x128xf32, #tpu.memory_space<vmem>>, %arg6: memref<128x128xbf16, #tpu.memory_space<vmem>>, %arg7: memref<1x128xf32, #tpu.memory_space<vmem>>, %arg8: memref<128x128xf32, #tpu.memory_space<vmem>>) attributes {dimension_semantics = [#tpu.dimension_semantics<parallel>], iteration_bounds = array<i64: 3>, scalar_prefetch = 0 : i64, scratch_operands = 0 : i64, tpu.core_type = #tpu.core_type<tc>, window_params = [{transform_indices = @transform_0, window_bounds = array<i64: 128, 384>}, {pipeline_mode = #tpu.pipeline_mode<synchronous>, transform_indices = @transform_1, window_bounds = array<i64: 384, 128>}, {pipeline_mode = #tpu.pipeline_mode<synchronous>, transform_indices = @transform_2, window_bounds = array<i64: 128, 128>}, {pipeline_mode = #tpu.pipeline_mode<synchronous>, transform_indices = @transform_3, window_bounds = array<i64: 1, 128>}, {transform_indices = @transform_4, window_bounds = array<i64: 128, 128>}, {pipeline_mode = #tpu.pipeline_mode<synchronous>, transform_indices = @transform_5, window_bounds = array<i64: 128, 128>}, {pipeline_mode = #tpu.pipeline_mode<synchronous>, transform_indices = @transform_6, window_bounds = array<i64: 1, 128>}, {transform_indices = @transform_7, window_bounds = array<i64: 128, 128>}]} {
    %c128_i32 = arith.constant 128 : i32
    %0 = arith.muli %arg0, %c128_i32 : i32
    %1 = tpu.assume_multiple %0, 128 : i32
    %c0 = arith.constant 0 : index
    %c0_0 = arith.constant 0 : index
    %2 = vector.load %arg1[%c0, %c0_0] : memref<128x384xbf16, #tpu.memory_space<vmem>>, vector<128x384xbf16>
    %c0_1 = arith.constant 0 : index
    %c0_2 = arith.constant 0 : index
    %3 = vector.load %arg2[%c0_1, %c0_2] : memref<384x128xf32, #tpu.memory_space<vmem>>, vector<384x128xf32>
    %4 = arith.truncf %3 : vector<384x128xf32> to vector<384x128xbf16>
    %cst = arith.constant dense<0.000000e+00> : vector<128x128xf32>
    %5 = tpu.matmul %2, %4, %cst {dimension_numbers = #tpu.dot_dimension_numbers<[1], [0], [0], [1], [0, 0, 1, 1], [], []>} : vector<128x384xbf16>, vector<384x128xbf16>, vector<128x128xf32> -> vector<128x128xf32>
    %6 = arith.truncf %5 : vector<128x128xf32> to vector<128x128xbf16>
    %c0_3 = arith.constant 0 : index
    %c0_4 = arith.constant 0 : index
    %7 = vector.load %arg3[%c0_3, %c0_4] : memref<128x128xbf16, #tpu.memory_space<vmem>>, vector<128x128xbf16>
    %cst_5 = arith.constant dense<0.000000e+00> : vector<128x128xf32>
    %8 = tpu.matmul %6, %7, %cst_5 {dimension_numbers = #tpu.dot_dimension_numbers<[1], [0], [0], [1], [0, 0, 1, 1], [], []>} : vector<128x128xbf16>, vector<128x128xbf16>, vector<128x128xf32> -> vector<128x128xf32>
    %c0_6 = arith.constant 0 : index
    %c0_7 = arith.constant 0 : index
    %9 = vector.load %arg4[%c0_6, %c0_7] : memref<1x128xf32, #tpu.memory_space<vmem>>, vector<1x128xf32>
    %10 = vector.broadcast %9 : vector<1x128xf32> to vector<128x128xf32>
    %11 = arith.addf %8, %10 : vector<128x128xf32>
    %cst_8 = arith.constant 0.000000e+00 : f32
    %12 = vector.broadcast %cst_8 : f32 to vector<128x128xf32>
    %13 = arith.maximumf %11, %12 : vector<128x128xf32>
    %14 = arith.index_cast %1 : i32 to index
    %c0_9 = arith.constant 0 : index
    %15 = vector.load %arg2[%14, %c0_9] : memref<384x128xf32, #tpu.memory_space<vmem>>, vector<128x128xf32>
    %16 = arith.addf %13, %15 : vector<128x128xf32>
    %c0_10 = arith.constant 0 : index
    %c0_11 = arith.constant 0 : index
    %17 = vector.load %arg5[%c0_10, %c0_11] : memref<128x128xf32, #tpu.memory_space<vmem>>, vector<128x128xf32>
    %18 = arith.addf %16, %17 : vector<128x128xf32>
    %19 = arith.truncf %18 : vector<128x128xf32> to vector<128x128xbf16>
    %c0_12 = arith.constant 0 : index
    %c0_13 = arith.constant 0 : index
    %20 = vector.load %arg6[%c0_12, %c0_13] : memref<128x128xbf16, #tpu.memory_space<vmem>>, vector<128x128xbf16>
    %cst_14 = arith.constant dense<0.000000e+00> : vector<128x128xf32>
    %21 = tpu.matmul %19, %20, %cst_14 {dimension_numbers = #tpu.dot_dimension_numbers<[1], [0], [0], [1], [0, 0, 1, 1], [], []>} : vector<128x128xbf16>, vector<128x128xbf16>, vector<128x128xf32> -> vector<128x128xf32>
    %c0_15 = arith.constant 0 : index
    %c0_16 = arith.constant 0 : index
    %22 = vector.load %arg7[%c0_15, %c0_16] : memref<1x128xf32, #tpu.memory_space<vmem>>, vector<1x128xf32>
    %23 = vector.broadcast %22 : vector<1x128xf32> to vector<128x128xf32>
    %24 = arith.addf %21, %23 : vector<128x128xf32>
    %25 = arith.negf %24 : vector<128x128xf32>
    %26 = math.exp %25 : vector<128x128xf32>
    %cst_17 = arith.constant 1.000000e+00 : f32
    %27 = vector.broadcast %cst_17 : f32 to vector<128x128xf32>
    %28 = arith.addf %27, %26 : vector<128x128xf32>
    %29 = arith.divf %27, %28 : vector<128x128xf32>
    %c0_18 = arith.constant 0 : index
    %c0_19 = arith.constant 0 : index
    %30 = vector.load %arg8[%c0_18, %c0_19] : memref<128x128xf32, #tpu.memory_space<vmem>>, vector<128x128xf32>
    tpu.vector_store %arg8[%c0_18, %c0_19], %29 {strides = array<i32>} : memref<128x128xf32, #tpu.memory_space<vmem>>, vector<128x128xf32>,
    return
  }
  func.func @transform_0(%arg0: i32) -> (i32, i32) {
    %c0_i32 = arith.constant 0 : i32
    %c0_i32_0 = arith.constant 0 : i32
    return %arg0, %c0_i32 : i32, i32
  }
  func.func @transform_1(%arg0: i32) -> (i32, i32) {
    %c0_i32 = arith.constant 0 : i32
    %c0_i32_0 = arith.constant 0 : i32
    %c0_i32_1 = arith.constant 0 : i32
    return %c0_i32, %c0_i32_0 : i32, i32
  }
  func.func @transform_2(%arg0: i32) -> (i32, i32) {
    %c0_i32 = arith.constant 0 : i32
    %c0_i32_0 = arith.constant 0 : i32
    %c0_i32_1 = arith.constant 0 : i32
    return %c0_i32, %c0_i32_0 : i32, i32
  }
  func.func @transform_3(%arg0: i32) -> (i32, i32) {
    %c0_i32 = arith.constant 0 : i32
    %c0_i32_0 = arith.constant 0 : i32
    %c0_i32_1 = arith.constant 0 : i32
    return %c0_i32, %c0_i32_0 : i32, i32
  }
  func.func @transform_4(%arg0: i32) -> (i32, i32) {
    %c0_i32 = arith.constant 0 : i32
    %c0_i32_0 = arith.constant 0 : i32
    return %arg0, %c0_i32 : i32, i32
  }
  func.func @transform_5(%arg0: i32) -> (i32, i32) {
    %c0_i32 = arith.constant 0 : i32
    %c0_i32_0 = arith.constant 0 : i32
    %c0_i32_1 = arith.constant 0 : i32
    return %c0_i32, %c0_i32_0 : i32, i32
  }
  func.func @transform_6(%arg0: i32) -> (i32, i32) {
    %c0_i32 = arith.constant 0 : i32
    %c0_i32_0 = arith.constant 0 : i32
    %c0_i32_1 = arith.constant 0 : i32
    return %c0_i32, %c0_i32_0 : i32, i32
  }
  func.func @transform_7(%arg0: i32) -> (i32, i32) {
    %c0_i32 = arith.constant 0 : i32
    %c0_i32_0 = arith.constant 0 : i32
    return %arg0, %c0_i32 : i32, i32
  }
}

</mosaic_0001>

<bundles_post_ra>
// kernel: forward.3
= control target key start
LH: loop header
LB: loop body
LE: loop exit
PB: predicated region body
PF: predicated region fallthrough
CT: control target
= control target key end

     0   :  { %s1785_s24 = smov 0   ;;  %s2161_s0 = inlined_call_operand.vmem [shape: bf16[384,384], index: 0, kind: input, shape index: {}]   ;;  %s2162_s1 = inlined_call_operand.vmem [shape: f32[384,128], index: 1, kind: input, shape index: {}]   ;;  %s2163_s2 = inlined_call_operand.vmem [shape: bf16[128,128], index: 2, kind: input, shape index: {}]   ;;  %s2164_s3 = inlined_call_operand.vmem [shape: f32[1,128], index: 3, kind: input, shape index: {}]   ;;  %s2165_s4 = inlined_call_operand.vmem [shape: f32[384,128], index: 4, kind: input, shape index: {}]   ;;  %s2166_s5 = inlined_call_operand.vmem [shape: bf16[128,128], index: 5, kind: input, shape index: {}]   ;;  %s2167_s6 = inlined_call_operand.vmem [shape: f32[1,128], index: 6, kind: input, shape index: {}]   ;;  %s2168_s7 = inlined_call_operand.vmem [shape: f32[384,128], index: 7, kind: output, shape index: {}]  }
   0x1 LB: > { %s1408_s25 = sadd.s32 4294967295, %s1743_s24   ;;  %p1412_p0 = scmp.ge.s32.totalorder %s1743_s24, 1  ;;  %s1743_s24 = sphi %s1785_s24, %s17_s24  }
   0x2   : > { %p250_p1 = scmp.lt.s32.totalorder %s1743_s24, 4 }
   0x4   : > { %p251_p2 = pnand %p1412_p0, %p250_p1 }
   0x5   : > { %s1413_s19 = sshll.u32 (!%p251_p2), %s1408_s25, 4  ;;  %s1419_s22 = sshll.u32 (!%p251_p2), %s1408_s25, 7 }
   0x6   : > { %254 = sbr.rel (%p251_p2) target bundleno = 648 (0x288), region = 48  ;;  %p289_p3 = scmp.lt.s32.totalorder (!%p251_p2), %s1413_s19, 47 }
   0x7   : > { %s2057_s26 = scalar_lea.vmem (!%p251_p2), %s2162_s1, %s1419_s22 }
   0xb   : > { %v354_v0 = vld [vmem:[%s2162_s1 + $0x70] sm:$0xff]  ;;  %v355_v1 = vld [vmem:[%s2162_s1 + $0x78] sm:$0xff]  ;;  %v352_v2 = vld [vmem:[%s2162_s1 + $0x60] sm:$0xff]  ;;  %s2170_s19 = smov (!%p289_p3, %s1413_s19), 47 }
   0xc   : > { %v395_v3 = vpack.c.bf16 %v355_v1, %v354_v0  ;;  %v353_v4 = vld [vmem:[%s2162_s1 + $0x68] sm:$0xff]  ;;  %v350_v6 = vld [vmem:[%s2162_s1 + $0x50] sm:$0xff]  ;;  %v351_v7 = vld [vmem:[%s2162_s1 + $0x58] sm:$0xff]  ;;  %s1662_s30 = smul.u32 12, %s2170_s19  ;;  %s1416_s27 = sshll.u32 %s2170_s19, 3 }
   0xd   : > { %v394_v5 = vpack.c.bf16 %v353_v4, %v352_v2  ;;  %v393_v8 = vpack.c.bf16 %v351_v7, %v350_v6  ;;  %v348_v9 = vld [vmem:[%s2162_s1 + $0x40] sm:$0xff]  ;;  %v349_v10 = vld [vmem:[%s2162_s1 + $0x48] sm:$0xff]  ;;  %v346_v12 = vld [vmem:[%s2162_s1 + $0x30] sm:$0xff]  ;;  %s2128_s11 = scalar_lea.vmem %s2168_s7, %s1416_s27 }
   0xe   : > { %1638 = vmatpush.bf16.msra.mxu1 %v395_v3  ;;  %1639 = vmatpush.bf16.msra.mxu2 %v395_v3  ;;  %v392_v11 = vpack.c.bf16 %v349_v10, %v348_v9  ;;  %v347_v13 = vld [vmem:[%s2162_s1 + $0x38] sm:$0xff]  ;;  %v344_v15 = vld [vmem:[%s2162_s1 + $0x20] sm:$0xff]  ;;  %v345_v16 = vld [vmem:[%s2162_s1 + $0x28] sm:$0xff]  ;;  %s1843_s14 = scalar_lea.vmem %s2161_s0, %s1662_s30  ;;  %s2066_s30 = scalar_lea.vmem %s2165_s4, %s1416_s27 }
   0xf   : > { %540 = vmatpush.bf16.msra.mxu0 %v395_v3  ;;  %1640 = vmatpush.bf16.msra.mxu3 %v395_v3  ;;  %v391_v14 = vpack.c.bf16 %v347_v13, %v346_v12  ;;  %v390_v17 = vpack.c.bf16 %v345_v16, %v344_v15  ;;  %v342_v18 = vld [vmem:[%s2162_s1 + $0x10] sm:$0xff]  ;;  %v343_v19 = vld [vmem:[%s2162_s1 + $0x18] sm:$0xff]  ;;  %v340_v21 = vld [vmem:[%s2162_s1] sm:$0xff] }
  0x10   : > { %v389_v20 = vpack.c.bf16 %v343_v19, %v342_v18  ;;  %v341_v22 = vld [vmem:[%s2162_s1 + $0x8] sm:$0xff]  ;;  %v386_v23 = vld [vmem:[%s2162_s1 + $0x170] sm:$0xff]  ;;  %v387_v24 = vld [vmem:[%s2162_s1 + $0x178] sm:$0xff] }
  0x11   : > { %v370_v25 = vld [vmem:[%s2162_s1 + $0xf0] sm:$0xff]  ;;  %v371_v26 = vld [vmem:[%s2162_s1 + $0xf8] sm:$0xff]  ;;  %v388_v28 = vpack.c.bf16 %v341_v22, %v340_v21  ;;  %v1470_v30 = vld [vmem:[%s1843_s14 + $0x60] sm:$0xf]  ;;  %v411_v32 = vpack.c.bf16 %v387_v24, %v386_v23 }
  0x12   : > { %1641 = vmatpush.bf16.msra.mxu1 %v394_v5  ;;  %1642 = vmatpush.bf16.msra.mxu2 %v394_v5  ;;  %v1446_v27 = vld [vmem:[%s1843_s14 + $0x30] sm:$0xf]  ;;  %v1605_v29 = vld [vmem:[%s1843_s14 + $0x38] sm:$0xf0]  ;;  %v1611_v31 = vld [vmem:[%s1843_s14 + $0x68] sm:$0xf0]  ;;  %v403_v33 = vpack.c.bf16 %v371_v26, %v370_v25 }
  0x13   : > { %541 = vmatpush.bf16.msra.mxu0 %v394_v5  ;;  %1643 = vmatpush.bf16.msra.mxu3 %v394_v5  ;;  %v384_v34 = vld [vmem:[%s2162_s1 + $0x160] sm:$0xff]  ;;  %v385_v35 = vld [vmem:[%s2162_s1 + $0x168] sm:$0xff]  ;;  %v1447_v38 = vor.u32 %v1605_v29, %v1446_v27  ;;  %v1471_v39 = vor.u32 %v1611_v31, %v1470_v30  ;;  %v382_v44 = vld [vmem:[%s2162_s1 + $0x150] sm:$0xff] }
  0x14   : > { %v368_v36 = vld [vmem:[%s2162_s1 + $0xe0] sm:$0xff]  ;;  %v369_v37 = vld [vmem:[%s2162_s1 + $0xe8] sm:$0xff]  ;;  %v410_v42 = vpack.c.bf16 %v385_v35, %v384_v34  ;;  %v383_v45 = vld [vmem:[%s2162_s1 + $0x158] sm:$0xff] }
  0x15   : > { %v1422_v40 = vld [vmem:[%s1843_s14] sm:$0xf]  ;;  %v1599_v41 = vld [vmem:[%s1843_s14 + $0x8] sm:$0xf0]  ;;  %v402_v43 = vpack.c.bf16 %v369_v37, %v368_v36  ;;  %v366_v46 = vld [vmem:[%s2162_s1 + $0xd0] sm:$0xff]  ;;  %v409_v49 = vpack.c.bf16 %v383_v45, %v382_v44 }
  0x16   : > { %1644 = vmatpush.bf16.msra.mxu1 %v393_v8  ;;  %1645 = vmatpush.bf16.msra.mxu2 %v393_v8  ;;  %v367_v47 = vld [vmem:[%s2162_s1 + $0xd8] sm:$0xff]  ;;  %v1423_v48 = vor.u32 %v1599_v41, %v1422_v40  ;;  %v380_v51 = vld [vmem:[%s2162_s1 + $0x140] sm:$0xff]  ;;  %v381_v52 = vld [vmem:[%s2162_s1 + $0x148] sm:$0xff] }
  0x17   : > { %542 = vmatpush.bf16.msra.mxu0 %v393_v8  ;;  %1646 = vmatpush.bf16.msra.mxu3 %v393_v8  ;;  %v401_v50 = vpack.c.bf16 %v367_v47, %v366_v46  ;;  %v364_v53 = vld [vmem:[%s2162_s1 + $0xc0] sm:$0xff]  ;;  %v365_v54 = vld [vmem:[%s2162_s1 + $0xc8] sm:$0xff]  ;;  %v408_v55 = vpack.c.bf16 %v381_v52, %v380_v51  ;;  %v378_v57 = vld [vmem:[%s2162_s1 + $0x130] sm:$0xff] }
  0x18   : > { %v400_v56 = vpack.c.bf16 %v365_v54, %v364_v53  ;;  %v379_v58 = vld [vmem:[%s2162_s1 + $0x138] sm:$0xff]  ;;  %v362_v59 = vld [vmem:[%s2162_s1 + $0xb0] sm:$0xff]  ;;  %v1458_v61 = vld [vmem:[%s1843_s14 + $0x48] sm:$0xf] }
  0x19   : > { %v363_v60 = vld [vmem:[%s2162_s1 + $0xb8] sm:$0xff]  ;;  %v1608_v62 = vld [vmem:[%s1843_s14 + $0x50] sm:$0xf0]  ;;  %v1614_v0 = vld [vmem:[%s1843_s14 + $0x80] sm:$0xf0]  ;;  %v407_v1 = vpack.c.bf16 %v379_v58, %v378_v57 }
  0x1a   : > { %1647 = vmatpush.bf16.msra.mxu1 %v392_v11  ;;  %1648 = vmatpush.bf16.msra.mxu2 %v392_v11  ;;  %v1482_v63 = vld [vmem:[%s1843_s14 + $0x78] sm:$0xf]  ;;  %v399_v2 = vpack.c.bf16 %v363_v60, %v362_v59  ;;  %v376_v3 = vld [vmem:[%s2162_s1 + $0x120] sm:$0xff]  ;;  %v377_v4 = vld [vmem:[%s2162_s1 + $0x128] sm:$0xff]  ;;  %v1459_v7 = vor.u32 %v1608_v62, %v1458_v61 }
  0x1b   : > { %543 = vmatpush.bf16.msra.mxu0 %v392_v11  ;;  %1649 = vmatpush.bf16.msra.mxu3 %v392_v11  ;;  %v360_v5 = vld [vmem:[%s2162_s1 + $0xa0] sm:$0xff]  ;;  %v361_v6 = vld [vmem:[%s2162_s1 + $0xa8] sm:$0xff]  ;;  %v1483_v8 = vor.u32 %v1614_v0, %v1482_v63  ;;  %v1434_v9 = vld [vmem:[%s1843_s14 + $0x18] sm:$0xf]  ;;  %v406_v11 = vpack.c.bf16 %v377_v4, %v376_v3 }
  0x1c   : > { %v1602_v10 = vld [vmem:[%s1843_s14 + $0x20] sm:$0xf0]  ;;  %v398_v12 = vpack.c.bf16 %v361_v6, %v360_v5  ;;  %v374_v13 = vld [vmem:[%s2162_s1 + $0x110] sm:$0xff]  ;;  %v359_v16 = vld [vmem:[%s2162_s1 + $0x98] sm:$0xff] }
  0x1d   : > { %v358_v15 = vld [vmem:[%s2162_s1 + $0x90] sm:$0xff]  ;;  %v373_v21 = vld [vmem:[%s2162_s1 + $0x108] sm:$0xff]  ;;  %v356_v22 = vld [vmem:[%s2162_s1 + $0x80] sm:$0xff] }
  0x1e   : > { %1650 = vmatpush.bf16.msra.mxu1 %v391_v14  ;;  %1651 = vmatpush.bf16.msra.mxu2 %v391_v14  ;;  %v397_v19 = vpack.c.bf16 %v359_v16, %v358_v15  ;;  %v357_v23 = vld [vmem:[%s2162_s1 + $0x88] sm:$0xff]  ;;  %v1598_v26 = vld [vmem:[%s1843_s14 + $0x4] sm:$0xf]  ;;  %v1424_v27 = vld [vmem:[%s1843_s14 + $0xc] sm:$0xf0] }
  0x1f   : > { %544 = vmatpush.bf16.msra.mxu0 %v391_v14  ;;  %1652 = vmatpush.bf16.msra.mxu3 %v391_v14  ;;  %v375_v14 = vld [vmem:[%s2162_s1 + $0x118] sm:$0xff]  ;;  %v396_v25 = vpack.c.bf16 %v357_v23, %v356_v22  ;;  %v1600_v29 = vld [vmem:[%s1843_s14 + $0x10] sm:$0xf0]  ;;  %v1427_v30 = vor.u32 %v1598_v26, %v1424_v27  ;;  %v1442_v34 = vld [vmem:[%s1843_s14 + $0x20] sm:$0xf] }
  0x20   : > { %v405_v18 = vpack.c.bf16 %v375_v14, %v374_v13  ;;  %v1603_v35 = vld [vmem:[%s1843_s14 + $0x28] sm:$0xf0]  ;;  %v1454_v40 = vld [vmem:[%s1843_s14 + $0x38] sm:$0xf]  ;;  %v1606_v41 = vld [vmem:[%s1843_s14 + $0x40] sm:$0xf0] }
  0x21   : > { %v1443_v37 = vor.u32 %v1603_v35, %v1442_v34  ;;  %v1607_v44 = vld [vmem:[%s1843_s14 + $0x4c] sm:$0xf]  ;;  %v1460_v45 = vld [vmem:[%s1843_s14 + $0x54] sm:$0xf0]  ;;  %v1466_v46 = vld [vmem:[%s1843_s14 + $0x50] sm:$0xf] }
  0x22   : > { %1653 = vmatpush.bf16.msra.mxu1 %v390_v17  ;;  %1654 = vmatpush.bf16.msra.mxu2 %v390_v17  ;;  %v1609_v47 = vld [vmem:[%s1843_s14 + $0x58] sm:$0xf0]  ;;  %v1610_v53 = vld [vmem:[%s1843_s14 + $0x64] sm:$0xf]  ;;  %v1472_v54 = vld [vmem:[%s1843_s14 + $0x6c] sm:$0xf0] }
  0x23   : > { %545 = vmatpush.bf16.msra.mxu0 %v390_v17  ;;  %1655 = vmatpush.bf16.msra.mxu3 %v390_v17  ;;  %v1435_v17 = vor.u32 %v1602_v10, %v1434_v9  ;;  %v1617_v51 = vld [vmem:[%s1843_s14 + $0x98] sm:$0xf0]  ;;  %v1475_v57 = vor.u32 %v1610_v53, %v1472_v54  ;;  %v1506_v59 = vld [vmem:[%s1843_s14 + $0xa8] sm:$0xf]  ;;  %v1620_v60 = vld [vmem:[%s1843_s14 + $0xb0] sm:$0xf0] }
  0x24   : > { %v1507_v61 = vor.u32 %v1620_v60, %v1506_v59  ;;  %v1613_v62 = vld [vmem:[%s1843_s14 + $0x7c] sm:$0xf]  ;;  %v1484_v63 = vld [vmem:[%s1843_s14 + $0x84] sm:$0xf0]  ;;  %v1490_v0 = vld [vmem:[%s1843_s14 + $0x80] sm:$0xf] }
  0x25   : > { %v1629_v4 = vld [vmem:[%s2163_s2 + $0x38] sm:$0xff]  ;;  %v1628_v5 = vld [vmem:[%s2163_s2 + $0x30] sm:$0xff]  ;;  %v1627_v6 = vld [vmem:[%s2163_s2 + $0x28] sm:$0xff] }
  0x26   : > { %1656 = vmatpush.bf16.msra.mxu1 %v389_v20  ;;  %1657 = vmatpush.bf16.msra.mxu2 %v389_v20  ;;  %v1502_v9 = vld [vmem:[%s1843_s14 + $0x98] sm:$0xf]  ;;  %v1618_v10 = vld [vmem:[%s1843_s14 + $0xa0] sm:$0xf0]  ;;  %v1514_v22 = vld [vmem:[%s1843_s14 + $0xb0] sm:$0xf] }
  0x27   : > { %546 = vmatpush.bf16.msra.mxu0 %v389_v20  ;;  %1658 = vmatpush.bf16.msra.mxu3 %v389_v20  ;;  %v372_v20 = vld [vmem:[%s2162_s1 + $0x100] sm:$0xff]  ;;  %v1503_v13 = vor.u32 %v1618_v10, %v1502_v9  ;;  %v1625_v15 = vld [vmem:[%s2163_s2 + $0x18] sm:$0xff] }
  0x28   : > { %v404_v24 = vpack.c.bf16 %v373_v21, %v372_v20  ;;  %v1619_v20 = vld [vmem:[%s1843_s14 + $0xac] sm:$0xf]  ;;  %v1508_v21 = vld [vmem:[%s1843_s14 + $0xb4] sm:$0xf0]  ;;  %v1621_v23 = vld [vmem:[%s1843_s14 + $0xb8] sm:$0xf0] }
  0x29   : > { %v1511_v26 = vor.u32 %v1619_v20, %v1508_v21  ;;  %v1515_v27 = vor.u32 %v1621_v23, %v1514_v22 }
  0x2a   : > { %1659 = vmatpush.bf16.msra.mxu1 %v388_v28  ;;  %1660 = vmatpush.bf16.msra.mxu2 %v388_v28 }
  0x2b   : > { %547 = vmatpush.bf16.msra.mxu0 %v388_v28  ;;  %1661 = vmatpush.bf16.msra.mxu3 %v388_v28  ;;  %v1430_v28 = vld [vmem:[%s1843_s14 + $0x8] sm:$0xf] }
  0x2c   : > { %v1431_v31 = vor.u32 %v1600_v29, %v1430_v28 }
  0x2d   : > { %558 = vmatmul.bf16.vlgmr.msra.gmra.mxu1 %v1447_v38  ;;  %568 = vmatmul.bf16.vlgmr.msra.gmra.mxu2 %v1471_v39  ;;  %v1604_v38 = vld [vmem:[%s1843_s14 + $0x34] sm:$0xf]  ;;  %v1448_v39 = vld [vmem:[%s1843_s14 + $0x3c] sm:$0xf0] }
  0x2e   : > { %638 = vmatpush.bf16.msrb.mxu2 %v411_v32  ;;  %589 = vmatpush.bf16.msrb.mxu1 %v403_v33  ;;  %v1601_v32 = vld [vmem:[%s1843_s14 + $0x1c] sm:$0xf]  ;;  %v1436_v33 = vld [vmem:[%s1843_s14 + $0x24] sm:$0xf0] }
  0x2f   : > { %548 = vmatmul.bf16.vlgmr.msra.gmra.mxu0 %v1423_v48  ;;  %v1439_v36 = vor.u32 %v1601_v32, %v1436_v33  ;;  %v1463_v48 = vor.u32 %v1607_v44, %v1460_v45  ;;  %763 = vmatpush.bf16.msrb.mxu3 %v1629_v4 }
  0x32   : > { %639 = vmatpush.bf16.msrb.mxu2 %v410_v42  ;;  %590 = vmatpush.bf16.msrb.mxu1 %v402_v43  ;;  %v1451_v42 = vor.u32 %v1604_v38, %v1448_v39  ;;  %v1455_v43 = vor.u32 %v1606_v41, %v1454_v40 }
  0x33   : > { %764 = vmatpush.bf16.msrb.mxu3 %v1628_v5 }
  0x36   : > { %640 = vmatpush.bf16.msrb.mxu2 %v409_v49  ;;  %591 = vmatpush.bf16.msrb.mxu1 %v401_v50  ;;  %v1467_v49 = vor.u32 %v1609_v47, %v1466_v46  ;;  %v1494_v50 = vld [vmem:[%s1843_s14 + $0x90] sm:$0xf] }
  0x37   : > { %v1495_v52 = vor.u32 %v1617_v51, %v1494_v50  ;;  %765 = vmatpush.bf16.msrb.mxu3 %v1627_v6 }
  0x39   : > { %578 = vmatmul.bf16.vlgmr.msra.gmra.mxu3 %v1495_v52 }
  0x3a   : > { %641 = vmatpush.bf16.msrb.mxu2 %v408_v55  ;;  %592 = vmatpush.bf16.msrb.mxu1 %v400_v56  ;;  %v1478_v55 = vld [vmem:[%s1843_s14 + $0x68] sm:$0xf]  ;;  %v1612_v56 = vld [vmem:[%s1843_s14 + $0x70] sm:$0xf0] }
  0x3b   : > { %v1479_v58 = vor.u32 %v1612_v56, %v1478_v55 }
  0x3d   : > { %563 = vmatmul.bf16.gmra.mxu1 %v1459_v7  ;;  %573 = vmatmul.bf16.gmra.mxu2 %v1483_v8  ;;  %v1616_v7 = vld [vmem:[%s1843_s14 + $0x94] sm:$0xf]  ;;  %v1496_v8 = vld [vmem:[%s1843_s14 + $0x9c] sm:$0xf0] }
  0x3e   : > { %642 = vmatpush.bf16.msrb.mxu2 %v407_v1  ;;  %593 = vmatpush.bf16.msrb.mxu1 %v399_v2  ;;  %v1615_v1 = vld [vmem:[%s1843_s14 + $0x88] sm:$0xf0]  ;;  %v1487_v2 = vor.u32 %v1613_v62, %v1484_v63 }
  0x3f   : > { %553 = vmatmul.bf16.gmra.mxu0 %v1435_v17  ;;  %v1491_v3 = vor.u32 %v1615_v1, %v1490_v0  ;;  %v1624_v17 = vld [vmem:[%s2163_s2 + $0x10] sm:$0xff] }
  0x42   : > { %643 = vmatpush.bf16.msrb.mxu2 %v406_v11  ;;  %594 = vmatpush.bf16.msrb.mxu1 %v398_v12  ;;  %v1626_v11 = vld [vmem:[%s2163_s2 + $0x20] sm:$0xff]  ;;  %v1499_v12 = vor.u32 %v1616_v7, %v1496_v8 }
  0x43   : > { %766 = vmatpush.bf16.msrb.mxu3 %v1626_v11 }
  0x46   : > { %644 = vmatpush.bf16.msrb.mxu2 %v405_v18  ;;  %595 = vmatpush.bf16.msrb.mxu1 %v397_v19  ;;  %v1623_v19 = vld [vmem:[%s2163_s2 + $0x8] sm:$0xff] }
  0x47   : > { %767 = vmatpush.bf16.msrb.mxu3 %v1625_v15 }
  0x49   : > { %583 = vmatmul.bf16.gmra.mxu3 %v1507_v61 }
  0x4a   : > { %645 = vmatpush.bf16.msrb.mxu2 %v404_v24  ;;  %596 = vmatpush.bf16.msrb.mxu1 %v396_v25  ;;  %v1622_v25 = vld [vmem:[%s2163_s2] sm:$0xff] }
  0x4b   : > { %768 = vmatpush.bf16.msrb.mxu3 %v1624_v17 }
  0x4d   : > { %597 = vmatmul.bf16.vlgmr.msrb.gmra.mxu1 %v1427_v30  ;;  %646 = vmatmul.bf16.vlgmr.msrb.gmra.mxu2 %v1431_v31 }
  0x4f   : > { %769 = vmatpush.bf16.msrb.mxu3 %v1623_v19 }
  0x53   : > { %770 = vmatpush.bf16.msrb.mxu3 %v1622_v25 }
  0x5d   : > { %602 = vmatmul.bf16.gmra.mxu1 %v1439_v36  ;;  %651 = vmatmul.bf16.gmra.mxu2 %v1443_v37 }
  0x6d   : > { %607 = vmatmul.bf16.gmra.mxu1 %v1451_v42  ;;  %656 = vmatmul.bf16.gmra.mxu2 %v1455_v43 }
  0x7d   : > { %612 = vmatmul.bf16.gmra.mxu1 %v1463_v48  ;;  %661 = vmatmul.bf16.gmra.mxu2 %v1467_v49 }
  0x8d   : > { %617 = vmatmul.bf16.gmra.mxu1 %v1475_v57  ;;  %666 = vmatmul.bf16.gmra.mxu2 %v1479_v58 }
  0x9d   : > { %622 = vmatmul.bf16.gmra.mxu1 %v1487_v2  ;;  %671 = vmatmul.bf16.gmra.mxu2 %v1491_v3 }
  0xaa   : > { %v559_v14 = vpop.f32.mrf.mxu1 }
  0xac   : > { %v549_v31 = vpop.f32.mrf.mxu0 }
  0xad   : > { %627 = vmatmul.bf16.gmra.mxu1 %v1499_v12  ;;  %676 = vmatmul.bf16.gmra.mxu2 %v1503_v13 }
  0xb0   : > { %v2006_v16 = vpop.f32.mrf.mxu2 }
  0xb2   : > { %v561_v18 = vpop.f32.mrf.mxu1 }
  0xb4   : > { %v551_v35 = vpop.f32.mrf.mxu0 }
  0xb8   : > { %v571_v24 = vpop.f32.mrf.mxu2 }
  0xba   : > { %v564_v28 = vpop.f32.mrf.mxu1 }
  0xbc   : > { %v554_v44 = vpop.f32.mrf.mxu0  ;;  %v579_v23 = vpop.f32.mrf.mxu3 }
  0xbd   : > { %632 = vmatmul.bf16.gmra.mxu1 %v1511_v26  ;;  %681 = vmatmul.bf16.gmra.mxu2 %v1515_v27 }
  0xc0   : > { %v574_v29 = vpop.f32.mrf.mxu2 }
  0xc2   : > { %v566_v30 = vpop.f32.mrf.mxu1 }
  0xc4   : > { %v556_v48 = vpop.f32.mrf.mxu0 }
  0xc8   : > { %v576_v32 = vpop.f32.mrf.mxu2 }
  0xca   : > { %v598_v33 = vpop.f32.mrf.mxu1 }
  0xcb   : > { %v599_v37 = vadd.f32 %v598_v33, %v549_v31  ;;  %v581_v33 = vpop.f32.mrf.mxu3 }
  0xd0   : > { %v647_v34 = vpop.f32.mrf.mxu2 }
  0xd1   : > { %v648_v40 = vadd.f32 %v647_v34, %v599_v37 }
  0xd2   : > { %v600_v36 = vpop.f32.mrf.mxu1 }
  0xd3   : > { %v601_v38 = vadd.f32 %v600_v36, %v551_v35  ;;  %v1634_v36 = vld [vmem:[%s2166_s5 + $0x20] sm:$0xff] }
  0xd8   : > { %v649_v39 = vpop.f32.mrf.mxu2 }
  0xd9   : > { %v650_v41 = vadd.f32 %v649_v39, %v601_v38 }
  0xda   : > { %v603_v42 = vpop.f32.mrf.mxu1 }
  0xdb   : > { %v687_v43 = vpack.c.bf16 %v650_v41, %v648_v40  ;;  %v604_v47 = vadd.f32 %v603_v42, %v554_v44  ;;  %v584_v42 = vpop.f32.mrf.mxu3  ;;  %v1633_v44 = vld [vmem:[%s2166_s5 + $0x18] sm:$0xff] }
  0xdd   : > { %771 = vmatmul.bf16.vlgmr.msrb.gmra.mxu3 %v687_v43 }
  0xe0   : > { %v652_v45 = vpop.f32.mrf.mxu2 }
  0xe1   : > { %v653_v51 = vadd.f32 %v652_v45, %v604_v47 }
  0xe2   : > { %v605_v46 = vpop.f32.mrf.mxu1 }
  0xe3   : > { %v606_v49 = vadd.f32 %v605_v46, %v556_v48  ;;  %v586_v47 = vpop.f32.mrf.mxu3  ;;  %v1632_v48 = vld [vmem:[%s2166_s5 + $0x10] sm:$0xff] }
  0xe8   : > { %v654_v50 = vpop.f32.mrf.mxu2 }
  0xe9   : > { %v655_v52 = vadd.f32 %v654_v50, %v606_v49 }
  0xea   : > { %v608_v53 = vpop.f32.mrf.mxu1 }
  0xeb   : > { %v688_v54 = vpack.c.bf16 %v655_v52, %v653_v51  ;;  %v609_v57 = vadd.f32 %v608_v53, %v559_v14  ;;  %v1631_v53 = vld [vmem:[%s2166_s5 + $0x8] sm:$0xff] }
  0xed   : > { %776 = vmatmul.bf16.gmra.mxu3 %v688_v54 }
  0xf0   : > { %v657_v55 = vpop.f32.mrf.mxu2 }
  0xf1   : > { %v658_v60 = vadd.f32 %v657_v55, %v609_v57  ;;  %v1630_v55 = vld [vmem:[%s2166_s5] sm:$0xff] }
  0xf2   : > { %v610_v56 = vpop.f32.mrf.mxu1 }
  0xf3   : > { %v611_v58 = vadd.f32 %v610_v56, %v561_v18  ;;  %v2049_v56 = vld [vmem:[%s2164_s3] ss:$0 sm:$0xff] }
  0xf8   : > { %v659_v59 = vpop.f32.mrf.mxu2 }
  0xf9   : > { %v660_v61 = vadd.f32 %v659_v59, %v611_v58 }
  0xfa   : > { %v613_v62 = vpop.f32.mrf.mxu1 }
  0xfb   : > { %v689_v63 = vpack.c.bf16 %v660_v61, %v658_v60  ;;  %v614_v2 = vadd.f32 %v613_v62, %v564_v28  ;;  %v829_v60 = vld [vmem:[%s2057_s26] sm:$0xff] }
  0xfd   : > { %781 = vmatmul.bf16.gmra.mxu3 %v689_v63  ;;  %v830_v63 = vld [vmem:[%s2057_s26 + $0x8] sm:$0xff] }
 0x100   : > { %v662_v0 = vpop.f32.mrf.mxu2 }
 0x101   : > { %v663_v5 = vadd.f32 %v662_v0, %v614_v2  ;;  %v861_v2 = vld [vmem:[%s2066_s30] sm:$0xff] }
 0x102   : > { %v615_v1 = vpop.f32.mrf.mxu1 }
 0x103   : > { %v616_v3 = vadd.f32 %v615_v1, %v566_v30 }
 0x108   : > { %v664_v4 = vpop.f32.mrf.mxu2 }
 0x109   : > { %v665_v6 = vadd.f32 %v664_v4, %v616_v3  ;;  %v862_v3 = vld [vmem:[%s2066_s30 + $0x8] sm:$0xff] }
 0x10a   : > { %v618_v7 = vpop.f32.mrf.mxu1 }
 0x10b   : > { %v690_v8 = vpack.c.bf16 %v665_v6, %v663_v5  ;;  %v619_v11 = vadd.f32 %v618_v7, %v2006_v16  ;;  %v1637_v16 = vld [vmem:[%s2166_s5 + $0x38] sm:$0xff] }
 0x10c   : > { %969 = vmatpush.bf16.msrb.mxu0 %v1637_v16 }
 0x10d   : > { %786 = vmatmul.bf16.gmra.mxu3 %v690_v8 }
 0x110   : > { %v667_v9 = vpop.f32.mrf.mxu2 }
 0x111   : > { %v668_v14 = vadd.f32 %v667_v9, %v619_v11  ;;  %v831_v11 = vld [vmem:[%s2057_s26 + $0x10] sm:$0xff] }
 0x112   : > { %v620_v10 = vpop.f32.mrf.mxu1 }
 0x113   : > { %v621_v12 = vadd.f32 %v620_v10, %v571_v24  ;;  %v1636_v24 = vld [vmem:[%s2166_s5 + $0x30] sm:$0xff] }
 0x114   : > { %970 = vmatpush.bf16.msrb.mxu0 %v1636_v24  ;;  %v834_v24 = vld [vmem:[%s2057_s26 + $0x28] sm:$0xff] }
 0x118   : > { %v669_v13 = vpop.f32.mrf.mxu2 }
 0x119   : > { %v670_v15 = vadd.f32 %v669_v13, %v621_v12 }
 0x11a   : > { %v623_v17 = vpop.f32.mrf.mxu1 }
 0x11b   : > { %v691_v18 = vpack.c.bf16 %v670_v15, %v668_v14  ;;  %v624_v21 = vadd.f32 %v623_v17, %v574_v29  ;;  %v832_v14 = vld [vmem:[%s2057_s26 + $0x18] sm:$0xff] }
 0x11d   : > { %791 = vmatmul.bf16.gmra.mxu3 %v691_v18  ;;  %v863_v18 = vld [vmem:[%s2066_s30 + $0x10] sm:$0xff] }
 0x120   : > { %v672_v19 = vpop.f32.mrf.mxu2 }
 0x121   : > { %v673_v26 = vadd.f32 %v672_v19, %v624_v21  ;;  %v864_v19 = vld [vmem:[%s2066_s30 + $0x18] sm:$0xff] }
 0x122   : > { %v625_v20 = vpop.f32.mrf.mxu1 }
 0x123   : > { %v626_v22 = vadd.f32 %v625_v20, %v576_v32  ;;  %v1635_v32 = vld [vmem:[%s2166_s5 + $0x28] sm:$0xff] }
 0x124   : > { %971 = vmatpush.bf16.msrb.mxu0 %v1635_v32  ;;  %v866_v32 = vld [vmem:[%s2066_s30 + $0x28] sm:$0xff] }
 0x128   : > { %v674_v25 = vpop.f32.mrf.mxu2  ;;  %972 = vmatpush.bf16.msrb.mxu0 %v1634_v36 }
 0x129   : > { %v675_v27 = vadd.f32 %v674_v25, %v626_v22 }
 0x12a   : > { %v628_v28 = vpop.f32.mrf.mxu1 }
 0x12b   : > { %v692_v30 = vpack.c.bf16 %v675_v27, %v673_v26  ;;  %v629_v34 = vadd.f32 %v628_v28, %v579_v23  ;;  %v833_v28 = vld [vmem:[%s2057_s26 + $0x20] sm:$0xff] }
 0x12c   : > { %973 = vmatpush.bf16.msrb.mxu0 %v1633_v44  ;;  %v836_v44 = vld [vmem:[%s2057_s26 + $0x38] sm:$0xff] }
 0x12d   : > { %796 = vmatmul.bf16.gmra.mxu3 %v692_v30 }
 0x130   : > { %v677_v31 = vpop.f32.mrf.mxu2  ;;  %974 = vmatpush.bf16.msrb.mxu0 %v1632_v48  ;;  %v868_v48 = vld [vmem:[%s2066_s30 + $0x38] sm:$0xff] }
 0x131   : > { %v678_v38 = vadd.f32 %v677_v31, %v629_v34 }
 0x132   : > { %v630_v29 = vpop.f32.mrf.mxu1 }
 0x133   : > { %v631_v35 = vadd.f32 %v630_v29, %v581_v33  ;;  %v865_v29 = vld [vmem:[%s2066_s30 + $0x20] sm:$0xff] }
 0x134   : > { %975 = vmatpush.bf16.msrb.mxu0 %v1631_v53 }
 0x138   : > { %v679_v37 = vpop.f32.mrf.mxu2  ;;  %976 = vmatpush.bf16.msrb.mxu0 %v1630_v55 }
 0x139   : > { %v680_v39 = vadd.f32 %v679_v37, %v631_v35 }
 0x13a   : > { %v633_v40 = vpop.f32.mrf.mxu1 }
 0x13b   : > { %v693_v41 = vpack.c.bf16 %v680_v39, %v678_v38  ;;  %v634_v46 = vadd.f32 %v633_v40, %v584_v42 }
 0x13d   : > { %801 = vmatmul.bf16.gmra.mxu3 %v693_v41  ;;  %v835_v41 = vld [vmem:[%s2057_s26 + $0x30] sm:$0xff] }
 0x140   : > { %v682_v43 = vpop.f32.mrf.mxu2 }
 0x141   : > { %v683_v51 = vadd.f32 %v682_v43, %v634_v46 }
 0x142   : > { %v635_v45 = vpop.f32.mrf.mxu1 }
 0x143   : > { %v636_v49 = vadd.f32 %v635_v45, %v586_v47  ;;  %v867_v47 = vld [vmem:[%s2066_s30 + $0x30] sm:$0xff] }
 0x148   : > { %v684_v50 = vpop.f32.mrf.mxu2 }
 0x149   : > { %v685_v52 = vadd.f32 %v684_v50, %v636_v49 }
 0x14b   : > { %v694_v54 = vpack.c.bf16 %v685_v52, %v683_v51 }
 0x14d   : > { %806 = vmatmul.bf16.gmra.mxu3 %v694_v54 }
 0x160   : > { %v772_v57 = vpop.f32.mrf.mxu3 }
 0x161   : > { %v773_v58 = vadd.f32 %v2049_v56, %v772_v57  ;;  %v837_v57 = vld [vmem:[%s2057_s26 + $0x40] sm:$0xff] }
 0x163   : > { %v812_v59 = vmax.f32 %v773_v58, 0.0 }
 0x165   : > { %v845_v0 = vadd.f32 %v829_v60, %v812_v59  ;;  %v838_v60 = vld [vmem:[%s2057_s26 + $0x48] sm:$0xff] }
 0x167   : > { %v877_v5 = vadd.f32 %v861_v2, %v845_v0  ;;  %v870_v0 = vld [vmem:[%s2066_s30 + $0x48] sm:$0xff] }
 0x168   : > { %v774_v61 = vpop.f32.mrf.mxu3 }
 0x169   : > { %v775_v62 = vadd.f32 %v2049_v56, %v774_v61 }
 0x16b   : > { %v813_v1 = vmax.f32 %v775_v62, 0.0 }
 0x16d   : > { %v846_v4 = vadd.f32 %v830_v63, %v813_v1  ;;  %v869_v63 = vld [vmem:[%s2066_s30 + $0x40] sm:$0xff] }
 0x16f   : > { %v878_v6 = vadd.f32 %v862_v3, %v846_v4 }
 0x170   : > { %v777_v7 = vpop.f32.mrf.mxu3 }
 0x171   : > { %v893_v8 = vpack.c.bf16 %v878_v6, %v877_v5  ;;  %v778_v9 = vadd.f32 %v2049_v56, %v777_v7 }
 0x173   : > { %977 = vmatmul.bf16.vlgmr.msrb.gmra.mxu0 %v893_v8  ;;  %v814_v10 = vmax.f32 %v778_v9, 0.0  ;;  %v839_v8 = vld [vmem:[%s2057_s26 + $0x50] sm:$0xff] }
 0x175   : > { %v847_v15 = vadd.f32 %v831_v11, %v814_v10  ;;  %v840_v11 = vld [vmem:[%s2057_s26 + $0x58] sm:$0xff] }
 0x177   : > { %v879_v21 = vadd.f32 %v863_v18, %v847_v15  ;;  %v872_v15 = vld [vmem:[%s2066_s30 + $0x58] sm:$0xff] }
 0x178   : > { %v779_v12 = vpop.f32.mrf.mxu3 }
 0x179   : > { %v780_v13 = vadd.f32 %v2049_v56, %v779_v12 }
 0x17b   : > { %v815_v17 = vmax.f32 %v780_v13, 0.0 }
 0x17d   : > { %v848_v20 = vadd.f32 %v832_v14, %v815_v17  ;;  %v871_v14 = vld [vmem:[%s2066_s30 + $0x50] sm:$0xff] }
 0x17f   : > { %v880_v22 = vadd.f32 %v864_v19, %v848_v20 }
 0x180   : > { %v782_v23 = vpop.f32.mrf.mxu3 }
 0x181   : > { %v894_v25 = vpack.c.bf16 %v880_v22, %v879_v21  ;;  %v783_v26 = vadd.f32 %v2049_v56, %v782_v23 }
 0x183   : > { %982 = vmatmul.bf16.gmra.mxu0 %v894_v25  ;;  %v816_v27 = vmax.f32 %v783_v26, 0.0  ;;  %v841_v25 = vld [vmem:[%s2057_s26 + $0x60] sm:$0xff] }
 0x185   : > { %v849_v31 = vadd.f32 %v833_v28, %v816_v27  ;;  %v842_v28 = vld [vmem:[%s2057_s26 + $0x68] sm:$0xff] }
 0x187   : > { %v881_v35 = vadd.f32 %v865_v29, %v849_v31  ;;  %v874_v31 = vld [vmem:[%s2066_s30 + $0x68] sm:$0xff] }
 0x188   : > { %v784_v30 = vpop.f32.mrf.mxu3 }
 0x189   : > { %v785_v16 = vadd.f32 %v2049_v56, %v784_v30 }
 0x18b   : > { %v817_v33 = vmax.f32 %v785_v16, 0.0 }
 0x18d   : > { %v850_v34 = vadd.f32 %v834_v24, %v817_v33  ;;  %v873_v24 = vld [vmem:[%s2066_s30 + $0x60] sm:$0xff] }
 0x18f   : > { %v882_v36 = vadd.f32 %v866_v32, %v850_v34 }
 0x190   : > { %v787_v37 = vpop.f32.mrf.mxu3 }
 0x191   : > { %v895_v38 = vpack.c.bf16 %v882_v36, %v881_v35  ;;  %v788_v39 = vadd.f32 %v2049_v56, %v787_v37 }
 0x193   : > { %987 = vmatmul.bf16.gmra.mxu0 %v895_v38  ;;  %v818_v40 = vmax.f32 %v788_v39, 0.0  ;;  %v843_v38 = vld [vmem:[%s2057_s26 + $0x70] sm:$0xff] }
 0x195   : > { %v851_v45 = vadd.f32 %v835_v41, %v818_v40  ;;  %v844_v41 = vld [vmem:[%s2057_s26 + $0x78] sm:$0xff] }
 0x197   : > { %v883_v50 = vadd.f32 %v867_v47, %v851_v45  ;;  %v876_v45 = vld [vmem:[%s2066_s30 + $0x78] sm:$0xff] }
 0x198   : > { %v789_v42 = vpop.f32.mrf.mxu3 }
 0x199   : > { %v790_v43 = vadd.f32 %v2049_v56, %v789_v42 }
 0x19b   : > { %v819_v46 = vmax.f32 %v790_v43, 0.0 }
 0x19d   : > { %v852_v49 = vadd.f32 %v836_v44, %v819_v46  ;;  %v875_v44 = vld [vmem:[%s2066_s30 + $0x70] sm:$0xff] }
 0x19f   : > { %v884_v51 = vadd.f32 %v868_v48, %v852_v49 }
 0x1a0   : > { %v792_v52 = vpop.f32.mrf.mxu3 }
 0x1a1   : > { %v896_v53 = vpack.c.bf16 %v884_v51, %v883_v50  ;;  %v793_v54 = vadd.f32 %v2049_v56, %v792_v52  ;;  %v2117_v50 = vld [vmem:[%s2167_s6] ss:$0 sm:$0xff] }
 0x1a3   : > { %992 = vmatmul.bf16.gmra.mxu0 %v896_v53  ;;  %v820_v55 = vmax.f32 %v793_v54, 0.0 }
 0x1a5   : > { %v853_v61 = vadd.f32 %v837_v57, %v820_v55 }
 0x1a7   : > { %v885_v2 = vadd.f32 %v869_v63, %v853_v61 }
 0x1a8   : > { %v794_v58 = vpop.f32.mrf.mxu3 }
 0x1a9   : > { %v795_v59 = vadd.f32 %v2049_v56, %v794_v58 }
 0x1ab   : > { %v821_v62 = vmax.f32 %v795_v59, 0.0 }
 0x1ad   : > { %v854_v1 = vadd.f32 %v838_v60, %v821_v62 }
 0x1af   : > { %v886_v3 = vadd.f32 %v870_v0, %v854_v1 }
 0x1b0   : > { %v797_v4 = vpop.f32.mrf.mxu3 }
 0x1b1   : > { %v897_v5 = vpack.c.bf16 %v886_v3, %v885_v2  ;;  %v798_v6 = vadd.f32 %v2049_v56, %v797_v4 }
 0x1b3   : > { %997 = vmatmul.bf16.gmra.mxu0 %v897_v5  ;;  %v822_v7 = vmax.f32 %v798_v6, 0.0 }
 0x1b5   : > { %v855_v12 = vadd.f32 %v839_v8, %v822_v7 }
 0x1b7   : > { %v887_v18 = vadd.f32 %v871_v14, %v855_v12 }
 0x1b8   : > { %v799_v9 = vpop.f32.mrf.mxu3 }
 0x1b9   : > { %v800_v10 = vadd.f32 %v2049_v56, %v799_v9 }
 0x1bb   : > { %v823_v13 = vmax.f32 %v800_v10, 0.0 }
 0x1bd   : > { %v856_v17 = vadd.f32 %v840_v11, %v823_v13 }
 0x1bf   : > { %v888_v19 = vadd.f32 %v872_v15, %v856_v17 }
 0x1c0   : > { %v802_v20 = vpop.f32.mrf.mxu3 }
 0x1c1   : > { %v898_v21 = vpack.c.bf16 %v888_v19, %v887_v18  ;;  %v803_v22 = vadd.f32 %v2049_v56, %v802_v20 }
 0x1c3   : > { %1002 = vmatmul.bf16.gmra.mxu0 %v898_v21  ;;  %v824_v23 = vmax.f32 %v803_v22, 0.0 }
 0x1c5   : > { %v857_v30 = vadd.f32 %v841_v25, %v824_v23 }
 0x1c7   : > { %v889_v29 = vadd.f32 %v873_v24, %v857_v30 }
 0x1c8   : > { %v804_v26 = vpop.f32.mrf.mxu3 }
 0x1c9   : > { %v805_v27 = vadd.f32 %v2049_v56, %v804_v26 }
 0x1cb   : > { %v825_v16 = vmax.f32 %v805_v27, 0.0 }
 0x1cd   : > { %v858_v33 = vadd.f32 %v842_v28, %v825_v16 }
 0x1cf   : > { %v890_v32 = vadd.f32 %v874_v31, %v858_v33 }
 0x1d0   : > { %v807_v34 = vpop.f32.mrf.mxu3 }
 0x1d1   : > { %v899_v35 = vpack.c.bf16 %v890_v32, %v889_v29  ;;  %v808_v36 = vadd.f32 %v2049_v56, %v807_v34 }
 0x1d3   : > { %1007 = vmatmul.bf16.gmra.mxu0 %v899_v35  ;;  %v826_v37 = vmax.f32 %v808_v36, 0.0 }
 0x1d5   : > { %v859_v42 = vadd.f32 %v843_v38, %v826_v37 }
 0x1d7   : > { %v891_v47 = vadd.f32 %v875_v44, %v859_v42 }
 0x1d8   : > { %v809_v39 = vpop.f32.mrf.mxu3 }
 0x1d9   : > { %v810_v40 = vadd.f32 %v2049_v56, %v809_v39 }
 0x1db   : > { %v827_v43 = vmax.f32 %v810_v40, 0.0 }
 0x1dd   : > { %v860_v46 = vadd.f32 %v844_v41, %v827_v43 }
 0x1df   : > { %v892_v48 = vadd.f32 %v876_v45, %v860_v46 }
 0x1e1   : > { %v900_v49 = vpack.c.bf16 %v892_v48, %v891_v47 }
 0x1e3   : > { %1012 = vmatmul.bf16.gmra.mxu0 %v900_v49 }
 0x1f0   : > { %v978_v51 = vpop.f32.mrf.mxu0 }
 0x1f1   : > { %v979_v52 = vadd.f32 %v2117_v50, %v978_v51 }
 0x1f3   : > { %v1580_v53 = vmul.f32 -1.442695, %v979_v52 }
 0x1f5   : > { %1673 = vpow2.f32 %v1580_v53 }
 0x1f8   : > { %v980_v56 = vpop.f32.mrf.mxu0 }
 0x1f9   : > { %v981_v54 = vadd.f32 %v2117_v50, %v980_v56 }
 0x1fb   : > { %v1674_v55 = vpop.eup %1673  ;;  %v1581_v57 = vmul.f32 -1.442695, %v981_v54 }
 0x1fc   : > { %v1066_v58 = vadd.f32 1.0, %v1674_v55 }
 0x1fd   : > { %1675 = vpow2.f32 %v1581_v57 }
 0x1fe   : > { %1677 = vrcp.f32 %v1066_v58  ;;  %v1093_v3 = vand.u32 2147483648, %v1066_v58  ;;  %v1091_v6 = vand.u32 2147483647, %v1066_v58  ;;  %vm1087_vm1 = vweird.f32 %v1066_v58 }
 0x200   : > { %v983_v59 = vpop.f32.mrf.mxu0  ;;  %v1094_v12 = vor.u32 1.1754944e-38, %v1093_v3  ;;  %vm1092_vm3 = vcmp.eq.f32.partialorder %v1091_v6, 8.507059e+37 }
 0x201   : > { %v984_v60 = vadd.f32 %v2117_v50, %v983_v59 }
 0x203   : > { %v1676_v61 = vpop.eup %1675  ;;  %v1582_v62 = vmul.f32 -1.442695, %v984_v60 }
 0x204   : > { %v1678_v63 = vpop.eup %1677  ;;  %v1067_v0 = vadd.f32 1.0, %v1676_v61 }
 0x205   : > { %v1083_v1 = vmul.f32 %v1678_v63, %v1066_v58  ;;  %1679 = vpow2.f32 %v1582_v62  ;;  %vm1088_vm0 = vweird.f32 %v1678_v63 }
 0x206   : > { %1681 = vrcp.f32 %v1067_v0  ;;  %vm1089_vm2 = vmor %vm1087_vm1, %vm1088_vm0  ;;  %v1108_v19 = vand.u32 2147483648, %v1067_v0  ;;  %v1106_v22 = vand.u32 2147483647, %v1067_v0  ;;  %vm1102_vm5 = vweird.f32 %v1067_v0 }
 0x207   : > { %v1084_v2 = vsub.f32 1.0, %v1083_v1 }
 0x208   : > { %v985_v4 = vpop.f32.mrf.mxu0  ;;  %v1109_v30 = vor.u32 1.1754944e-38, %v1108_v19  ;;  %vm1107_vm7 = vcmp.eq.f32.partialorder %v1106_v22, 8.507059e+37 }
 0x209   : > { %v1085_v5 = vmul.f32 %v1678_v63, %v1084_v2  ;;  %v986_v7 = vadd.f32 %v2117_v50, %v985_v4 }
 0x20b   : > { %v1680_v8 = vpop.eup %1679  ;;  %v1086_v9 = vadd.f32 %v1678_v63, %v1085_v5  ;;  %v1583_v10 = vmul.f32 -1.442695, %v986_v7 }
 0x20c   : > { %v1682_v11 = vpop.eup %1681  ;;  %v1068_v13 = vadd.f32 1.0, %v1680_v8 }
 0x20d   : > { %v1090_v14 = vsel %vm1089_vm2, %v1678_v63, %v1086_v9  ;;  %v1098_v15 = vmul.f32 %v1682_v11, %v1067_v0  ;;  %1683 = vpow2.f32 %v1583_v10  ;;  %vm1103_vm4 = vweird.f32 %v1682_v11 }
 0x20e   : > { %v1095_v17 = vsel %vm1092_vm3, %v1094_v12, %v1090_v14  ;;  %1685 = vrcp.f32 %v1068_v13  ;;  %vm1104_vm6 = vmor %vm1102_vm5, %vm1103_vm4  ;;  %v1123_v32 = vand.u32 2147483648, %v1068_v13  ;;  %v1121_v36 = vand.u32 2147483647, %v1068_v13 }
 0x20f   : > { %1322 = vst [vmem:[%s2128_s11] sm:$0xff] %v1095_v17  ;;  %v1099_v18 = vsub.f32 1.0, %v1098_v15  ;;  %vm1117_vm9 = vweird.f32 %v1068_v13 }
 0x210   : > { %v988_v20 = vpop.f32.mrf.mxu0  ;;  %v1124_v42 = vor.u32 1.1754944e-38, %v1123_v32  ;;  %vm1122_vm11 = vcmp.eq.f32.partialorder %v1121_v36, 8.507059e+37 }
 0x211   : > { %v1100_v21 = vmul.f32 %v1682_v11, %v1099_v18  ;;  %v989_v23 = vadd.f32 %v2117_v50, %v988_v20 }
 0x213   : > { %v1684_v25 = vpop.eup %1683  ;;  %v1101_v26 = vadd.f32 %v1682_v11, %v1100_v21  ;;  %v1584_v27 = vmul.f32 -1.442695, %v989_v23 }
 0x214   : > { %v1686_v28 = vpop.eup %1685  ;;  %v1069_v16 = vadd.f32 1.0, %v1684_v25 }
 0x215   : > { %v1105_v24 = vsel %vm1104_vm6, %v1682_v11, %v1101_v26  ;;  %v1113_v31 = vmul.f32 %v1686_v28, %v1068_v13  ;;  %1687 = vpow2.f32 %v1584_v27  ;;  %vm1118_vm8 = vweird.f32 %v1686_v28 }
 0x216   : > { %v1110_v33 = vsel %vm1107_vm7, %v1109_v30, %v1105_v24  ;;  %1689 = vrcp.f32 %v1069_v16  ;;  %vm1119_vm10 = vmor %vm1117_vm9, %vm1118_vm8  ;;  %v1138_v48 = vand.u32 2147483648, %v1069_v16  ;;  %v1136_v52 = vand.u32 2147483647, %v1069_v16 }
 0x217   : > { %1323 = vst [vmem:[%s2128_s11 + $0x8] sm:$0xff] %v1110_v33  ;;  %v1114_v29 = vsub.f32 1.0, %v1113_v31  ;;  %vm1132_vm13 = vweird.f32 %v1069_v16 }
 0x218   : > { %v990_v34 = vpop.f32.mrf.mxu0  ;;  %v1139_v58 = vor.u32 1.1754944e-38, %v1138_v48  ;;  %vm1137_vm15 = vcmp.eq.f32.partialorder %v1136_v52, 8.507059e+37 }
 0x219   : > { %v1115_v35 = vmul.f32 %v1686_v28, %v1114_v29  ;;  %v991_v37 = vadd.f32 %v2117_v50, %v990_v34 }
 0x21b   : > { %v1688_v38 = vpop.eup %1687  ;;  %v1116_v39 = vadd.f32 %v1686_v28, %v1115_v35  ;;  %v1585_v40 = vmul.f32 -1.442695, %v991_v37 }
 0x21c   : > { %v1690_v41 = vpop.eup %1689  ;;  %v1070_v43 = vadd.f32 1.0, %v1688_v38 }
 0x21d   : > { %v1120_v44 = vsel %vm1119_vm10, %v1686_v28, %v1116_v39  ;;  %v1128_v45 = vmul.f32 %v1690_v41, %v1069_v16  ;;  %1691 = vpow2.f32 %v1585_v40  ;;  %vm1133_vm12 = vweird.f32 %v1690_v41 }
 0x21e   : > { %v1125_v46 = vsel %vm1122_vm11, %v1124_v42, %v1120_v44  ;;  %1693 = vrcp.f32 %v1070_v43  ;;  %vm1134_vm14 = vmor %vm1132_vm13, %vm1133_vm12  ;;  %v1153_v0 = vand.u32 2147483648, %v1070_v43  ;;  %v1151_v3 = vand.u32 2147483647, %v1070_v43 }
 0x21f   : > { %1324 = vst [vmem:[%s2128_s11 + $0x10] sm:$0xff] %v1125_v46  ;;  %v1129_v47 = vsub.f32 1.0, %v1128_v45  ;;  %vm1147_vm1 = vweird.f32 %v1070_v43 }
 0x220   : > { %v993_v49 = vpop.f32.mrf.mxu0  ;;  %v1154_v9 = vor.u32 1.1754944e-38, %v1153_v0  ;;  %vm1152_vm3 = vcmp.eq.f32.partialorder %v1151_v3, 8.507059e+37 }
 0x221   : > { %v1130_v51 = vmul.f32 %v1690_v41, %v1129_v47  ;;  %v994_v53 = vadd.f32 %v2117_v50, %v993_v49 }
 0x223   : > { %v1692_v56 = vpop.eup %1691  ;;  %v1131_v54 = vadd.f32 %v1690_v41, %v1130_v51  ;;  %v1586_v55 = vmul.f32 -1.442695, %v994_v53 }
 0x224   : > { %v1694_v57 = vpop.eup %1693  ;;  %v1071_v59 = vadd.f32 1.0, %v1692_v56 }
 0x225   : > { %v1135_v60 = vsel %vm1134_vm14, %v1690_v41, %v1131_v54  ;;  %v1143_v61 = vmul.f32 %v1694_v57, %v1070_v43  ;;  %1695 = vpow2.f32 %v1586_v55  ;;  %vm1148_vm0 = vweird.f32 %v1694_v57 }
 0x226   : > { %v1140_v62 = vsel %vm1137_vm15, %v1139_v58, %v1135_v60  ;;  %1697 = vrcp.f32 %v1071_v59  ;;  %vm1149_vm2 = vmor %vm1147_vm1, %vm1148_vm0  ;;  %v1168_v15 = vand.u32 2147483648, %v1071_v59  ;;  %v1166_v19 = vand.u32 2147483647, %v1071_v59 }
 0x227   : > { %1325 = vst [vmem:[%s2128_s11 + $0x18] sm:$0xff] %v1140_v62  ;;  %v1144_v63 = vsub.f32 1.0, %v1143_v61  ;;  %vm1162_vm5 = vweird.f32 %v1071_v59 }
 0x228   : > { %v995_v1 = vpop.f32.mrf.mxu0  ;;  %v1169_v26 = vor.u32 1.1754944e-38, %v1168_v15  ;;  %vm1167_vm7 = vcmp.eq.f32.partialorder %v1166_v19, 8.507059e+37 }
 0x229   : > { %v1145_v2 = vmul.f32 %v1694_v57, %v1144_v63  ;;  %v996_v4 = vadd.f32 %v2117_v50, %v995_v1 }
 0x22b   : > { %v1696_v5 = vpop.eup %1695  ;;  %v1146_v6 = vadd.f32 %v1694_v57, %v1145_v2  ;;  %v1587_v7 = vmul.f32 -1.442695, %v996_v4 }
 0x22c   : > { %v1698_v8 = vpop.eup %1697  ;;  %v1072_v10 = vadd.f32 1.0, %v1696_v5 }
 0x22d   : > { %v1150_v11 = vsel %vm1149_vm2, %v1694_v57, %v1146_v6  ;;  %v1158_v12 = vmul.f32 %v1698_v8, %v1071_v59  ;;  %1699 = vpow2.f32 %v1587_v7  ;;  %vm1163_vm4 = vweird.f32 %v1698_v8 }
 0x22e   : > { %v1155_v13 = vsel %vm1152_vm3, %v1154_v9, %v1150_v11  ;;  %1701 = vrcp.f32 %v1072_v10  ;;  %vm1164_vm6 = vmor %vm1162_vm5, %vm1163_vm4  ;;  %v1183_v31 = vand.u32 2147483648, %v1072_v10  ;;  %v1181_v32 = vand.u32 2147483647, %v1072_v10 }
 0x22f   : > { %1326 = vst [vmem:[%s2128_s11 + $0x20] sm:$0xff] %v1155_v13  ;;  %v1159_v14 = vsub.f32 1.0, %v1158_v12  ;;  %vm1177_vm9 = vweird.f32 %v1072_v10 }
 0x230   : > { %v998_v17 = vpop.f32.mrf.mxu0  ;;  %v1184_v39 = vor.u32 1.1754944e-38, %v1183_v31  ;;  %vm1182_vm11 = vcmp.eq.f32.partialorder %v1181_v32, 8.507059e+37 }
 0x231   : > { %v1160_v18 = vmul.f32 %v1698_v8, %v1159_v14  ;;  %v999_v20 = vadd.f32 %v2117_v50, %v998_v17 }
 0x233   : > { %v1700_v21 = vpop.eup %1699  ;;  %v1161_v22 = vadd.f32 %v1698_v8, %v1160_v18  ;;  %v1588_v23 = vmul.f32 -1.442695, %v999_v20 }
 0x234   : > { %v1702_v25 = vpop.eup %1701  ;;  %v1073_v27 = vadd.f32 1.0, %v1700_v21 }
 0x235   : > { %v1165_v28 = vsel %vm1164_vm6, %v1698_v8, %v1161_v22  ;;  %v1173_v30 = vmul.f32 %v1702_v25, %v1072_v10  ;;  %1703 = vpow2.f32 %v1588_v23  ;;  %vm1178_vm8 = vweird.f32 %v1702_v25 }
 0x236   : > { %v1170_v16 = vsel %vm1167_vm7, %v1169_v26, %v1165_v28  ;;  %1705 = vrcp.f32 %v1073_v27  ;;  %vm1179_vm10 = vmor %vm1177_vm9, %vm1178_vm8  ;;  %v1198_v45 = vand.u32 2147483648, %v1073_v27  ;;  %v1196_v48 = vand.u32 2147483647, %v1073_v27 }
 0x237   : > { %1327 = vst [vmem:[%s2128_s11 + $0x28] sm:$0xff] %v1170_v16  ;;  %v1174_v24 = vsub.f32 1.0, %v1173_v30  ;;  %vm1192_vm13 = vweird.f32 %v1073_v27 }
 0x238   : > { %v1000_v33 = vpop.f32.mrf.mxu0  ;;  %v1199_v54 = vor.u32 1.1754944e-38, %v1198_v45  ;;  %vm1197_vm15 = vcmp.eq.f32.partialorder %v1196_v48, 8.507059e+37 }
 0x239   : > { %v1175_v29 = vmul.f32 %v1702_v25, %v1174_v24  ;;  %v1001_v34 = vadd.f32 %v2117_v50, %v1000_v33 }
 0x23b   : > { %v1704_v35 = vpop.eup %1703  ;;  %v1176_v36 = vadd.f32 %v1702_v25, %v1175_v29  ;;  %v1589_v37 = vmul.f32 -1.442695, %v1001_v34 }
 0x23c   : > { %v1706_v38 = vpop.eup %1705  ;;  %v1074_v40 = vadd.f32 1.0, %v1704_v35 }
 0x23d   : > { %v1180_v41 = vsel %vm1179_vm10, %v1702_v25, %v1176_v36  ;;  %v1188_v42 = vmul.f32 %v1706_v38, %v1073_v27  ;;  %1707 = vpow2.f32 %v1589_v37  ;;  %vm1193_vm12 = vweird.f32 %v1706_v38 }
 0x23e   : > { %v1185_v43 = vsel %vm1182_vm11, %v1184_v39, %v1180_v41  ;;  %1709 = vrcp.f32 %v1074_v40  ;;  %vm1194_vm14 = vmor %vm1192_vm13, %vm1193_vm12  ;;  %v1213_v61 = vand.u32 2147483648, %v1074_v40  ;;  %v1211_v0 = vand.u32 2147483647, %v1074_v40 }
 0x23f   : > { %1328 = vst [vmem:[%s2128_s11 + $0x30] sm:$0xff] %v1185_v43  ;;  %v1189_v44 = vsub.f32 1.0, %v1188_v42  ;;  %vm1207_vm1 = vweird.f32 %v1074_v40 }
 0x240   : > { %v1003_v46 = vpop.f32.mrf.mxu0  ;;  %v1214_v6 = vor.u32 1.1754944e-38, %v1213_v61  ;;  %vm1212_vm3 = vcmp.eq.f32.partialorder %v1211_v0, 8.507059e+37 }
 0x241   : > { %v1190_v47 = vmul.f32 %v1706_v38, %v1189_v44  ;;  %v1004_v49 = vadd.f32 %v2117_v50, %v1003_v46 }
 0x243   : > { %v1708_v51 = vpop.eup %1707  ;;  %v1191_v52 = vadd.f32 %v1706_v38, %v1190_v47  ;;  %v1590_v53 = vmul.f32 -1.442695, %v1004_v49 }
 0x244   : > { %v1710_v56 = vpop.eup %1709  ;;  %v1075_v55 = vadd.f32 1.0, %v1708_v51 }
 0x245   : > { %v1195_v57 = vsel %vm1194_vm14, %v1706_v38, %v1191_v52  ;;  %v1203_v58 = vmul.f32 %v1710_v56, %v1074_v40  ;;  %1711 = vpow2.f32 %v1590_v53  ;;  %vm1208_vm0 = vweird.f32 %v1710_v56 }
 0x246   : > { %v1200_v59 = vsel %vm1197_vm15, %v1199_v54, %v1195_v57  ;;  %1713 = vrcp.f32 %v1075_v55  ;;  %vm1209_vm2 = vmor %vm1207_vm1, %vm1208_vm0  ;;  %v1228_v12 = vand.u32 2147483648, %v1075_v55  ;;  %v1226_v15 = vand.u32 2147483647, %v1075_v55 }
 0x247   : > { %1329 = vst [vmem:[%s2128_s11 + $0x38] sm:$0xff] %v1200_v59  ;;  %v1204_v60 = vsub.f32 1.0, %v1203_v58  ;;  %vm1222_vm5 = vweird.f32 %v1075_v55 }
 0x248   : > { %v1005_v62 = vpop.f32.mrf.mxu0  ;;  %v1229_v22 = vor.u32 1.1754944e-38, %v1228_v12  ;;  %vm1227_vm7 = vcmp.eq.f32.partialorder %v1226_v15, 8.507059e+37 }
 0x249   : > { %v1205_v63 = vmul.f32 %v1710_v56, %v1204_v60  ;;  %v1006_v1 = vadd.f32 %v2117_v50, %v1005_v62 }
 0x24b   : > { %v1712_v2 = vpop.eup %1711  ;;  %v1206_v3 = vadd.f32 %v1710_v56, %v1205_v63  ;;  %v1591_v4 = vmul.f32 -1.442695, %v1006_v1 }
 0x24c   : > { %v1714_v5 = vpop.eup %1713  ;;  %v1076_v7 = vadd.f32 1.0, %v1712_v2 }
 0x24d   : > { %v1210_v8 = vsel %vm1209_vm2, %v1710_v56, %v1206_v3  ;;  %v1218_v9 = vmul.f32 %v1714_v5, %v1075_v55  ;;  %1715 = vpow2.f32 %v1591_v4  ;;  %vm1223_vm4 = vweird.f32 %v1714_v5 }
 0x24e   : > { %v1215_v10 = vsel %vm1212_vm3, %v1214_v6, %v1210_v8  ;;  %1717 = vrcp.f32 %v1076_v7  ;;  %vm1224_vm6 = vmor %vm1222_vm5, %vm1223_vm4  ;;  %v1243_v30 = vand.u32 2147483648, %v1076_v7  ;;  %v1241_v31 = vand.u32 2147483647, %v1076_v7 }
 0x24f   : > { %1330 = vst [vmem:[%s2128_s11 + $0x40] sm:$0xff] %v1215_v10  ;;  %v1219_v11 = vsub.f32 1.0, %v1218_v9  ;;  %vm1237_vm9 = vweird.f32 %v1076_v7 }
 0x250   : > { %v1008_v13 = vpop.f32.mrf.mxu0  ;;  %v1244_v36 = vor.u32 1.1754944e-38, %v1243_v30  ;;  %vm1242_vm11 = vcmp.eq.f32.partialorder %v1241_v31, 8.507059e+37 }
 0x251   : > { %v1220_v14 = vmul.f32 %v1714_v5, %v1219_v11  ;;  %v1009_v17 = vadd.f32 %v2117_v50, %v1008_v13 }
 0x253   : > { %v1716_v18 = vpop.eup %1715  ;;  %v1221_v19 = vadd.f32 %v1714_v5, %v1220_v14  ;;  %v1592_v20 = vmul.f32 -1.442695, %v1009_v17 }
 0x254   : > { %v1718_v21 = vpop.eup %1717  ;;  %v1077_v23 = vadd.f32 1.0, %v1716_v18 }
 0x255   : > { %v1225_v25 = vsel %vm1224_vm6, %v1714_v5, %v1221_v19  ;;  %v1233_v26 = vmul.f32 %v1718_v21, %v1076_v7  ;;  %1719 = vpow2.f32 %v1592_v20  ;;  %vm1238_vm8 = vweird.f32 %v1718_v21 }
 0x256   : > { %v1230_v27 = vsel %vm1227_vm7, %v1229_v22, %v1225_v25  ;;  %1721 = vrcp.f32 %v1077_v23  ;;  %vm1239_vm10 = vmor %vm1237_vm9, %vm1238_vm8  ;;  %v1258_v42 = vand.u32 2147483648, %v1077_v23  ;;  %v1256_v45 = vand.u32 2147483647, %v1077_v23 }
 0x257   : > { %1331 = vst [vmem:[%s2128_s11 + $0x48] sm:$0xff] %v1230_v27  ;;  %v1234_v28 = vsub.f32 1.0, %v1233_v26  ;;  %vm1252_vm13 = vweird.f32 %v1077_v23 }
 0x258   : > { %v1010_v16 = vpop.f32.mrf.mxu0  ;;  %v1259_v52 = vor.u32 1.1754944e-38, %v1258_v42  ;;  %vm1257_vm15 = vcmp.eq.f32.partialorder %v1256_v45, 8.507059e+37 }
 0x259   : > { %v1235_v24 = vmul.f32 %v1718_v21, %v1234_v28  ;;  %v1011_v33 = vadd.f32 %v2117_v50, %v1010_v16 }
 0x25b   : > { %v1720_v29 = vpop.eup %1719  ;;  %v1236_v32 = vadd.f32 %v1718_v21, %v1235_v24  ;;  %v1593_v34 = vmul.f32 -1.442695, %v1011_v33 }
 0x25c   : > { %v1722_v35 = vpop.eup %1721  ;;  %v1078_v37 = vadd.f32 1.0, %v1720_v29 }
 0x25d   : > { %v1240_v38 = vsel %vm1239_vm10, %v1718_v21, %v1236_v32  ;;  %v1248_v39 = vmul.f32 %v1722_v35, %v1077_v23  ;;  %1723 = vpow2.f32 %v1593_v34  ;;  %vm1253_vm12 = vweird.f32 %v1722_v35 }
 0x25e   : > { %v1245_v40 = vsel %vm1242_vm11, %v1244_v36, %v1240_v38  ;;  %1725 = vrcp.f32 %v1078_v37  ;;  %vm1254_vm14 = vmor %vm1252_vm13, %vm1253_vm12  ;;  %v1273_v58 = vand.u32 2147483648, %v1078_v37  ;;  %v1271_v61 = vand.u32 2147483647, %v1078_v37 }
 0x25f   : > { %1332 = vst [vmem:[%s2128_s11 + $0x50] sm:$0xff] %v1245_v40  ;;  %v1249_v41 = vsub.f32 1.0, %v1248_v39  ;;  %vm1267_vm1 = vweird.f32 %v1078_v37 }
 0x260   : > { %v1013_v43 = vpop.f32.mrf.mxu0  ;;  %v1274_v3 = vor.u32 1.1754944e-38, %v1273_v58  ;;  %vm1272_vm3 = vcmp.eq.f32.partialorder %v1271_v61, 8.507059e+37 }
 0x261   : > { %v1250_v44 = vmul.f32 %v1722_v35, %v1249_v41  ;;  %v1014_v46 = vadd.f32 %v2117_v50, %v1013_v43 }
 0x263   : > { %v1724_v47 = vpop.eup %1723  ;;  %v1251_v48 = vadd.f32 %v1722_v35, %v1250_v44  ;;  %v1594_v49 = vmul.f32 -1.442695, %v1014_v46 }
 0x264   : > { %v1726_v51 = vpop.eup %1725  ;;  %v1079_v53 = vadd.f32 1.0, %v1724_v47 }
 0x265   : > { %v1255_v56 = vsel %vm1254_vm14, %v1722_v35, %v1251_v48  ;;  %v1263_v54 = vmul.f32 %v1726_v51, %v1078_v37  ;;  %1727 = vpow2.f32 %v1594_v49  ;;  %vm1268_vm0 = vweird.f32 %v1726_v51 }
 0x266   : > { %v1260_v55 = vsel %vm1257_vm15, %v1259_v52, %v1255_v56  ;;  %1729 = vrcp.f32 %v1079_v53  ;;  %vm1269_vm2 = vmor %vm1267_vm1, %vm1268_vm0  ;;  %v1288_v9 = vand.u32 2147483648, %v1079_v53  ;;  %vm1282_vm5 = vweird.f32 %v1079_v53 }
 0x267   : > { %1333 = vst [vmem:[%s2128_s11 + $0x58] sm:$0xff] %v1260_v55  ;;  %v1264_v57 = vsub.f32 1.0, %v1263_v54 }
 0x268   : > { %v1015_v59 = vpop.f32.mrf.mxu0  ;;  %v1289_v14 = vor.u32 1.1754944e-38, %v1288_v9 }
 0x269   : > { %v1265_v60 = vmul.f32 %v1726_v51, %v1264_v57  ;;  %v1016_v62 = vadd.f32 %v2117_v50, %v1015_v59  ;;  %v1286_v50 = vand.u32 2147483647, %v1079_v53 }
 0x26b   : > { %v1728_v63 = vpop.eup %1727  ;;  %v1266_v0 = vadd.f32 %v1726_v51, %v1265_v60  ;;  %v1595_v1 = vmul.f32 -1.442695, %v1016_v62  ;;  %vm1287_vm7 = vcmp.eq.f32.partialorder %v1286_v50, 8.507059e+37 }
 0x26c   : > { %v1730_v2 = vpop.eup %1729  ;;  %v1080_v4 = vadd.f32 1.0, %v1728_v63 }
 0x26d   : > { %v1270_v5 = vsel %vm1269_vm2, %v1726_v51, %v1266_v0  ;;  %v1278_v6 = vmul.f32 %v1730_v2, %v1079_v53  ;;  %1731 = vpow2.f32 %v1595_v1  ;;  %vm1283_vm4 = vweird.f32 %v1730_v2 }
 0x26e   : > { %v1275_v7 = vsel %vm1272_vm3, %v1274_v3, %v1270_v5  ;;  %1733 = vrcp.f32 %v1080_v4  ;;  %vm1284_vm6 = vmor %vm1282_vm5, %vm1283_vm4  ;;  %v1303_v21 = vand.u32 2147483648, %v1080_v4  ;;  %v1301_v23 = vand.u32 2147483647, %v1080_v4 }
 0x26f   : > { %1334 = vst [vmem:[%s2128_s11 + $0x60] sm:$0xff] %v1275_v7  ;;  %v1279_v8 = vsub.f32 1.0, %v1278_v6  ;;  %vm1297_vm9 = vweird.f32 %v1080_v4 }
 0x270   : > { %v1304_v27 = vor.u32 1.1754944e-38, %v1303_v21  ;;  %vm1302_vm11 = vcmp.eq.f32.partialorder %v1301_v23, 8.507059e+37 }
 0x271   : > { %v1280_v10 = vmul.f32 %v1730_v2, %v1279_v8 }
 0x273   : > { %v1732_v11 = vpop.eup %1731  ;;  %v1281_v12 = vadd.f32 %v1730_v2, %v1280_v10 }
 0x274   : > { %v1734_v13 = vpop.eup %1733  ;;  %v1081_v15 = vadd.f32 1.0, %v1732_v11 }
 0x275   : > { %v1285_v17 = vsel %vm1284_vm6, %v1730_v2, %v1281_v12  ;;  %v1293_v18 = vmul.f32 %v1734_v13, %v1080_v4  ;;  %vm1298_vm8 = vweird.f32 %v1734_v13 }
 0x276   : > { %v1290_v19 = vsel %vm1287_vm7, %v1289_v14, %v1285_v17  ;;  %1735 = vrcp.f32 %v1081_v15  ;;  %vm1299_vm10 = vmor %vm1297_vm9, %vm1298_vm8  ;;  %v1318_v31 = vand.u32 2147483648, %v1081_v15  ;;  %v1316_v29 = vand.u32 2147483647, %v1081_v15 }
 0x277   : > { %1335 = vst [vmem:[%s2128_s11 + $0x68] sm:$0xff] %v1290_v19  ;;  %v1294_v20 = vsub.f32 1.0, %v1293_v18  ;;  %vm1312_vm13 = vweird.f32 %v1081_v15 }
 0x278   : > { %v1319_v34 = vor.u32 1.1754944e-38, %v1318_v31  ;;  %vm1317_vm15 = vcmp.eq.f32.partialorder %v1316_v29, 8.507059e+37 }
 0x279   : > { %v1295_v22 = vmul.f32 %v1734_v13, %v1294_v20 }
 0x27b   : > { %v1296_v25 = vadd.f32 %v1734_v13, %v1295_v22 }
 0x27c   : > { %v1736_v26 = vpop.eup %1735 }
 0x27d   : > { %v1300_v28 = vsel %vm1299_vm10, %v1734_v13, %v1296_v25  ;;  %v1308_v30 = vmul.f32 %v1736_v26, %v1081_v15  ;;  %vm1313_vm12 = vweird.f32 %v1736_v26 }
 0x27e   : > { %v1305_v16 = vsel %vm1302_vm11, %v1304_v27, %v1300_v28  ;;  %vm1314_vm14 = vmor %vm1312_vm13, %vm1313_vm12 }
 0x27f   : > { %1336 = vst [vmem:[%s2128_s11 + $0x70] sm:$0xff] %v1305_v16  ;;  %v1309_v24 = vsub.f32 1.0, %v1308_v30 }
 0x281   : > { %v1310_v33 = vmul.f32 %v1736_v26, %v1309_v24 }
 0x283   : > { %v1311_v32 = vadd.f32 %v1736_v26, %v1310_v33 }
 0x285   : > { %v1315_v35 = vsel %vm1314_vm14, %v1736_v26, %v1311_v32 }
 0x286   : > { %v1320_v36 = vsel %vm1317_vm15, %v1319_v34, %v1315_v35 }
 0x287   : > { %1337 = vst [vmem:[%s2128_s11 + $0x78] sm:$0xff] %v1320_v36 }
 0x288 PF: > { %s17_s24 = sadd.s32 1, %s1743_s24  }
 0x289   : > { %p14_p4 = scmp.ge.s32.totalorder %s17_s24, 5  }
 0x28b   :  { %16 = sbr.rel (!%p14_p4) target bundleno = 1 (0x1), region = 82 }

// kernel: forward.2
= control target key start
LH: loop header
LB: loop body
LE: loop exit
PB: predicated region body
PF: predicated region fallthrough
CT: control target
= control target key end

     0   :  { %s1399_s24 = smov 0   ;;  %s1790_s0 = inlined_call_operand.vmem [shape: bf16[384,384], index: 0, kind: input, shape index: {}]   ;;  %s1791_s1 = inlined_call_operand.vmem [shape: f32[384,128], index: 1, kind: input, shape index: {}]   ;;  %s1792_s2 = inlined_call_operand.vmem [shape: bf16[128,128], index: 2, kind: input, shape index: {}]   ;;  %s1793_s3 = inlined_call_operand.vmem [shape: f32[1,128], index: 3, kind: input, shape index: {}]   ;;  %s1794_s4 = inlined_call_operand.vmem [shape: bf16[128,128], index: 4, kind: input, shape index: {}]   ;;  %s1795_s5 = inlined_call_operand.vmem [shape: f32[1,128], index: 5, kind: input, shape index: {}]   ;;  %s1796_s6 = inlined_call_operand.vmem [shape: f32[384,128], index: 6, kind: output, shape index: {0}]   ;;  %s1797_s7 = inlined_call_operand.vmem [shape: f32[384,128], index: 7, kind: output, shape index: {1}]  }
   0x1 LB: > { %s1102_s25 = sadd.s32 4294967295, %s1357_s24   ;;  %p1106_p0 = scmp.ge.s32.totalorder %s1357_s24, 1  ;;  %s1357_s24 = sphi %s1399_s24, %s18_s24  }
   0x2   : > { %p242_p1 = scmp.lt.s32.totalorder %s1357_s24, 4 }
   0x4   : > { %p243_p2 = pnand %p1106_p0, %p242_p1 }
   0x5   : > { %s1107_s19 = sshll.u32 (!%p243_p2), %s1102_s25, 4  ;;  %s1113_s13 = sshll.u32 (!%p243_p2), %s1102_s25, 7 }
   0x6   : > { %246 = sbr.rel (%p243_p2) target bundleno = 478 (0x1de), region = 44  ;;  %p281_p3 = scmp.lt.s32.totalorder (!%p243_p2), %s1107_s19, 47 }
   0x7   : > { %s1660_s20 = scalar_lea.vmem (!%p243_p2), %s1791_s1, %s1113_s13 }
   0xb   : > { %v346_v0 = vld [vmem:[%s1791_s1 + $0x70] sm:$0xff]  ;;  %v347_v1 = vld [vmem:[%s1791_s1 + $0x78] sm:$0xff]  ;;  %v344_v2 = vld [vmem:[%s1791_s1 + $0x60] sm:$0xff]  ;;  %s1799_s19 = smov (!%p281_p3, %s1107_s19), 47 }
   0xc   : > { %v387_v3 = vpack.c.bf16 %v347_v1, %v346_v0  ;;  %v345_v4 = vld [vmem:[%s1791_s1 + $0x68] sm:$0xff]  ;;  %v342_v6 = vld [vmem:[%s1791_s1 + $0x50] sm:$0xff]  ;;  %v343_v7 = vld [vmem:[%s1791_s1 + $0x58] sm:$0xff]  ;;  %s1340_s30 = smul.u32 12, %s1799_s19  ;;  %s1110_s27 = sshll.u32 %s1799_s19, 3 }
   0xd   : > { %v386_v5 = vpack.c.bf16 %v345_v4, %v344_v2  ;;  %v385_v8 = vpack.c.bf16 %v343_v7, %v342_v6  ;;  %v340_v9 = vld [vmem:[%s1791_s1 + $0x40] sm:$0xff]  ;;  %v341_v10 = vld [vmem:[%s1791_s1 + $0x48] sm:$0xff]  ;;  %v338_v12 = vld [vmem:[%s1791_s1 + $0x30] sm:$0xff]  ;;  %s1733_s12 = scalar_lea.vmem %s1796_s6, %s1110_s27 }
   0xe   : > { %1316 = vmatpush.bf16.msra.mxu1 %v387_v3  ;;  %1317 = vmatpush.bf16.msra.mxu2 %v387_v3  ;;  %v384_v11 = vpack.c.bf16 %v341_v10, %v340_v9  ;;  %v339_v13 = vld [vmem:[%s1791_s1 + $0x38] sm:$0xff]  ;;  %v336_v15 = vld [vmem:[%s1791_s1 + $0x20] sm:$0xff]  ;;  %v337_v16 = vld [vmem:[%s1791_s1 + $0x28] sm:$0xff]  ;;  %s1457_s14 = scalar_lea.vmem %s1790_s0, %s1340_s30  ;;  %s1710_s30 = scalar_lea.vmem %s1797_s7, %s1110_s27 }
   0xf   : > { %532 = vmatpush.bf16.msra.mxu0 %v387_v3  ;;  %1318 = vmatpush.bf16.msra.mxu3 %v387_v3  ;;  %v383_v14 = vpack.c.bf16 %v339_v13, %v338_v12  ;;  %v382_v17 = vpack.c.bf16 %v337_v16, %v336_v15  ;;  %v334_v18 = vld [vmem:[%s1791_s1 + $0x10] sm:$0xff]  ;;  %v335_v19 = vld [vmem:[%s1791_s1 + $0x18] sm:$0xff]  ;;  %v332_v21 = vld [vmem:[%s1791_s1] sm:$0xff] }
  0x10   : > { %v381_v20 = vpack.c.bf16 %v335_v19, %v334_v18  ;;  %v333_v22 = vld [vmem:[%s1791_s1 + $0x8] sm:$0xff]  ;;  %v378_v23 = vld [vmem:[%s1791_s1 + $0x170] sm:$0xff]  ;;  %v379_v24 = vld [vmem:[%s1791_s1 + $0x178] sm:$0xff] }
  0x11   : > { %v362_v25 = vld [vmem:[%s1791_s1 + $0xf0] sm:$0xff]  ;;  %v363_v26 = vld [vmem:[%s1791_s1 + $0xf8] sm:$0xff]  ;;  %v380_v28 = vpack.c.bf16 %v333_v22, %v332_v21  ;;  %v1164_v30 = vld [vmem:[%s1457_s14 + $0x60] sm:$0xf]  ;;  %v403_v32 = vpack.c.bf16 %v379_v24, %v378_v23 }
  0x12   : > { %1319 = vmatpush.bf16.msra.mxu1 %v386_v5  ;;  %1320 = vmatpush.bf16.msra.mxu2 %v386_v5  ;;  %v1140_v27 = vld [vmem:[%s1457_s14 + $0x30] sm:$0xf]  ;;  %v1283_v29 = vld [vmem:[%s1457_s14 + $0x38] sm:$0xf0]  ;;  %v1289_v31 = vld [vmem:[%s1457_s14 + $0x68] sm:$0xf0]  ;;  %v395_v33 = vpack.c.bf16 %v363_v26, %v362_v25 }
  0x13   : > { %533 = vmatpush.bf16.msra.mxu0 %v386_v5  ;;  %1321 = vmatpush.bf16.msra.mxu3 %v386_v5  ;;  %v376_v34 = vld [vmem:[%s1791_s1 + $0x160] sm:$0xff]  ;;  %v377_v35 = vld [vmem:[%s1791_s1 + $0x168] sm:$0xff]  ;;  %v1141_v38 = vor.u32 %v1283_v29, %v1140_v27  ;;  %v1165_v39 = vor.u32 %v1289_v31, %v1164_v30  ;;  %v374_v44 = vld [vmem:[%s1791_s1 + $0x150] sm:$0xff] }
  0x14   : > { %v360_v36 = vld [vmem:[%s1791_s1 + $0xe0] sm:$0xff]  ;;  %v361_v37 = vld [vmem:[%s1791_s1 + $0xe8] sm:$0xff]  ;;  %v402_v42 = vpack.c.bf16 %v377_v35, %v376_v34  ;;  %v375_v45 = vld [vmem:[%s1791_s1 + $0x158] sm:$0xff] }
  0x15   : > { %v1116_v40 = vld [vmem:[%s1457_s14] sm:$0xf]  ;;  %v1277_v41 = vld [vmem:[%s1457_s14 + $0x8] sm:$0xf0]  ;;  %v394_v43 = vpack.c.bf16 %v361_v37, %v360_v36  ;;  %v358_v46 = vld [vmem:[%s1791_s1 + $0xd0] sm:$0xff]  ;;  %v401_v49 = vpack.c.bf16 %v375_v45, %v374_v44 }
  0x16   : > { %1322 = vmatpush.bf16.msra.mxu1 %v385_v8  ;;  %1323 = vmatpush.bf16.msra.mxu2 %v385_v8  ;;  %v359_v47 = vld [vmem:[%s1791_s1 + $0xd8] sm:$0xff]  ;;  %v1117_v48 = vor.u32 %v1277_v41, %v1116_v40  ;;  %v372_v51 = vld [vmem:[%s1791_s1 + $0x140] sm:$0xff]  ;;  %v373_v52 = vld [vmem:[%s1791_s1 + $0x148] sm:$0xff] }
  0x17   : > { %534 = vmatpush.bf16.msra.mxu0 %v385_v8  ;;  %1324 = vmatpush.bf16.msra.mxu3 %v385_v8  ;;  %v393_v50 = vpack.c.bf16 %v359_v47, %v358_v46  ;;  %v356_v53 = vld [vmem:[%s1791_s1 + $0xc0] sm:$0xff]  ;;  %v357_v54 = vld [vmem:[%s1791_s1 + $0xc8] sm:$0xff]  ;;  %v400_v55 = vpack.c.bf16 %v373_v52, %v372_v51  ;;  %v370_v57 = vld [vmem:[%s1791_s1 + $0x130] sm:$0xff] }
  0x18   : > { %v392_v56 = vpack.c.bf16 %v357_v54, %v356_v53  ;;  %v371_v58 = vld [vmem:[%s1791_s1 + $0x138] sm:$0xff]  ;;  %v354_v59 = vld [vmem:[%s1791_s1 + $0xb0] sm:$0xff]  ;;  %v1152_v61 = vld [vmem:[%s1457_s14 + $0x48] sm:$0xf] }
  0x19   : > { %v355_v60 = vld [vmem:[%s1791_s1 + $0xb8] sm:$0xff]  ;;  %v1286_v62 = vld [vmem:[%s1457_s14 + $0x50] sm:$0xf0]  ;;  %v1292_v0 = vld [vmem:[%s1457_s14 + $0x80] sm:$0xf0]  ;;  %v399_v1 = vpack.c.bf16 %v371_v58, %v370_v57 }
  0x1a   : > { %1325 = vmatpush.bf16.msra.mxu1 %v384_v11  ;;  %1326 = vmatpush.bf16.msra.mxu2 %v384_v11  ;;  %v1176_v63 = vld [vmem:[%s1457_s14 + $0x78] sm:$0xf]  ;;  %v391_v2 = vpack.c.bf16 %v355_v60, %v354_v59  ;;  %v368_v3 = vld [vmem:[%s1791_s1 + $0x120] sm:$0xff]  ;;  %v369_v4 = vld [vmem:[%s1791_s1 + $0x128] sm:$0xff]  ;;  %v1153_v7 = vor.u32 %v1286_v62, %v1152_v61 }
  0x1b   : > { %535 = vmatpush.bf16.msra.mxu0 %v384_v11  ;;  %1327 = vmatpush.bf16.msra.mxu3 %v384_v11  ;;  %v352_v5 = vld [vmem:[%s1791_s1 + $0xa0] sm:$0xff]  ;;  %v353_v6 = vld [vmem:[%s1791_s1 + $0xa8] sm:$0xff]  ;;  %v1177_v8 = vor.u32 %v1292_v0, %v1176_v63  ;;  %v1128_v9 = vld [vmem:[%s1457_s14 + $0x18] sm:$0xf]  ;;  %v398_v11 = vpack.c.bf16 %v369_v4, %v368_v3 }
  0x1c   : > { %v1280_v10 = vld [vmem:[%s1457_s14 + $0x20] sm:$0xf0]  ;;  %v390_v12 = vpack.c.bf16 %v353_v6, %v352_v5  ;;  %v366_v13 = vld [vmem:[%s1791_s1 + $0x110] sm:$0xff]  ;;  %v351_v16 = vld [vmem:[%s1791_s1 + $0x98] sm:$0xff] }
  0x1d   : > { %v350_v15 = vld [vmem:[%s1791_s1 + $0x90] sm:$0xff]  ;;  %v365_v21 = vld [vmem:[%s1791_s1 + $0x108] sm:$0xff]  ;;  %v348_v22 = vld [vmem:[%s1791_s1 + $0x80] sm:$0xff] }
  0x1e   : > { %1328 = vmatpush.bf16.msra.mxu1 %v383_v14  ;;  %1329 = vmatpush.bf16.msra.mxu2 %v383_v14  ;;  %v389_v19 = vpack.c.bf16 %v351_v16, %v350_v15  ;;  %v349_v23 = vld [vmem:[%s1791_s1 + $0x88] sm:$0xff]  ;;  %v1276_v26 = vld [vmem:[%s1457_s14 + $0x4] sm:$0xf]  ;;  %v1118_v27 = vld [vmem:[%s1457_s14 + $0xc] sm:$0xf0] }
  0x1f   : > { %536 = vmatpush.bf16.msra.mxu0 %v383_v14  ;;  %1330 = vmatpush.bf16.msra.mxu3 %v383_v14  ;;  %v367_v14 = vld [vmem:[%s1791_s1 + $0x118] sm:$0xff]  ;;  %v388_v25 = vpack.c.bf16 %v349_v23, %v348_v22  ;;  %v1278_v29 = vld [vmem:[%s1457_s14 + $0x10] sm:$0xf0]  ;;  %v1121_v30 = vor.u32 %v1276_v26, %v1118_v27  ;;  %v1136_v34 = vld [vmem:[%s1457_s14 + $0x20] sm:$0xf] }
  0x20   : > { %v397_v18 = vpack.c.bf16 %v367_v14, %v366_v13  ;;  %v1281_v35 = vld [vmem:[%s1457_s14 + $0x28] sm:$0xf0]  ;;  %v1148_v40 = vld [vmem:[%s1457_s14 + $0x38] sm:$0xf]  ;;  %v1284_v41 = vld [vmem:[%s1457_s14 + $0x40] sm:$0xf0] }
  0x21   : > { %v1137_v37 = vor.u32 %v1281_v35, %v1136_v34  ;;  %v1285_v44 = vld [vmem:[%s1457_s14 + $0x4c] sm:$0xf]  ;;  %v1154_v45 = vld [vmem:[%s1457_s14 + $0x54] sm:$0xf0]  ;;  %v1160_v46 = vld [vmem:[%s1457_s14 + $0x50] sm:$0xf] }
  0x22   : > { %1331 = vmatpush.bf16.msra.mxu1 %v382_v17  ;;  %1332 = vmatpush.bf16.msra.mxu2 %v382_v17  ;;  %v1287_v47 = vld [vmem:[%s1457_s14 + $0x58] sm:$0xf0]  ;;  %v1288_v53 = vld [vmem:[%s1457_s14 + $0x64] sm:$0xf]  ;;  %v1166_v54 = vld [vmem:[%s1457_s14 + $0x6c] sm:$0xf0] }
  0x23   : > { %537 = vmatpush.bf16.msra.mxu0 %v382_v17  ;;  %1333 = vmatpush.bf16.msra.mxu3 %v382_v17  ;;  %v1129_v17 = vor.u32 %v1280_v10, %v1128_v9  ;;  %v1295_v51 = vld [vmem:[%s1457_s14 + $0x98] sm:$0xf0]  ;;  %v1169_v57 = vor.u32 %v1288_v53, %v1166_v54  ;;  %v1200_v59 = vld [vmem:[%s1457_s14 + $0xa8] sm:$0xf]  ;;  %v1298_v60 = vld [vmem:[%s1457_s14 + $0xb0] sm:$0xf0] }
  0x24   : > { %v1201_v61 = vor.u32 %v1298_v60, %v1200_v59  ;;  %v1291_v62 = vld [vmem:[%s1457_s14 + $0x7c] sm:$0xf]  ;;  %v1178_v63 = vld [vmem:[%s1457_s14 + $0x84] sm:$0xf0]  ;;  %v1184_v0 = vld [vmem:[%s1457_s14 + $0x80] sm:$0xf] }
  0x25   : > { %v1315_v4 = vld [vmem:[%s1794_s4 + $0x38] sm:$0xff]  ;;  %v1314_v6 = vld [vmem:[%s1794_s4 + $0x30] sm:$0xff]  ;;  %v1305_v9 = vld [vmem:[%s1792_s2 + $0x28] sm:$0xff] }
  0x26   : > { %1334 = vmatpush.bf16.msra.mxu1 %v381_v20  ;;  %1335 = vmatpush.bf16.msra.mxu2 %v381_v20  ;;  %v1307_v5 = vld [vmem:[%s1792_s2 + $0x38] sm:$0xff]  ;;  %v1294_v10 = vld [vmem:[%s1457_s14 + $0x94] sm:$0xf]  ;;  %v1296_v13 = vld [vmem:[%s1457_s14 + $0xa0] sm:$0xf0] }
  0x27   : > { %538 = vmatpush.bf16.msra.mxu0 %v381_v20  ;;  %1336 = vmatpush.bf16.msra.mxu3 %v381_v20  ;;  %v364_v20 = vld [vmem:[%s1791_s1 + $0x100] sm:$0xff]  ;;  %v1302_v23 = vld [vmem:[%s1792_s2 + $0x10] sm:$0xff]  ;;  %v1301_v26 = vld [vmem:[%s1792_s2 + $0x8] sm:$0xff] }
  0x28   : > { %v396_v24 = vpack.c.bf16 %v365_v21, %v364_v20  ;;  %v1312_v14 = vld [vmem:[%s1794_s4 + $0x20] sm:$0xff]  ;;  %v1303_v20 = vld [vmem:[%s1792_s2 + $0x18] sm:$0xff]  ;;  %v1310_v21 = vld [vmem:[%s1794_s4 + $0x10] sm:$0xff] }
  0x29   : > { %v1304_v15 = vld [vmem:[%s1792_s2 + $0x20] sm:$0xff]  ;;  %v1297_v27 = vld [vmem:[%s1457_s14 + $0xac] sm:$0xf] }
  0x2a   : > { %1337 = vmatpush.bf16.msra.mxu1 %v380_v28  ;;  %1338 = vmatpush.bf16.msra.mxu2 %v380_v28  ;;  %v821_v34 = vld [vmem:[%s1660_s20] sm:$0xff]  ;;  %v822_v35 = vld [vmem:[%s1660_s20 + $0x8] sm:$0xff] }
  0x2b   : > { %539 = vmatpush.bf16.msra.mxu0 %v380_v28  ;;  %1339 = vmatpush.bf16.msra.mxu3 %v380_v28  ;;  %v1124_v28 = vld [vmem:[%s1457_s14 + $0x8] sm:$0xf]  ;;  %v825_v54 = vld [vmem:[%s1660_s20 + $0x20] sm:$0xff] }
  0x2c   : > { %v1125_v31 = vor.u32 %v1278_v29, %v1124_v28  ;;  %v1202_v28 = vld [vmem:[%s1457_s14 + $0xb4] sm:$0xf0]  ;;  %v1208_v29 = vld [vmem:[%s1457_s14 + $0xb0] sm:$0xf] }
  0x2d   : > { %550 = vmatmul.bf16.vlgmr.msra.gmra.mxu1 %v1141_v38  ;;  %560 = vmatmul.bf16.vlgmr.msra.gmra.mxu2 %v1165_v39  ;;  %v1282_v38 = vld [vmem:[%s1457_s14 + $0x34] sm:$0xf]  ;;  %v1142_v39 = vld [vmem:[%s1457_s14 + $0x3c] sm:$0xf0] }
  0x2e   : > { %630 = vmatpush.bf16.msrb.mxu2 %v403_v32  ;;  %581 = vmatpush.bf16.msrb.mxu1 %v395_v33  ;;  %v1279_v32 = vld [vmem:[%s1457_s14 + $0x1c] sm:$0xf]  ;;  %v1130_v33 = vld [vmem:[%s1457_s14 + $0x24] sm:$0xf0] }
  0x2f   : > { %540 = vmatmul.bf16.vlgmr.msra.gmra.mxu0 %v1117_v48  ;;  %v1133_v36 = vor.u32 %v1279_v32, %v1130_v33  ;;  %v1157_v48 = vor.u32 %v1285_v44, %v1154_v45  ;;  %755 = vmatpush.bf16.msrb.mxu3 %v1307_v5  ;;  %v1300_v33 = vld [vmem:[%s1792_s2] sm:$0xff]  ;;  %v823_v44 = vld [vmem:[%s1660_s20 + $0x10] sm:$0xff]  ;;  %v824_v45 = vld [vmem:[%s1660_s20 + $0x18] sm:$0xff] }
  0x30   : > { %913 = vmatpush.bf16.msrb.mxu0 %v1315_v4  ;;  %v827_v4 = vld [vmem:[%s1660_s20 + $0x30] sm:$0xff]  ;;  %v828_v5 = vld [vmem:[%s1660_s20 + $0x38] sm:$0xff] }
  0x32   : > { %631 = vmatpush.bf16.msrb.mxu2 %v402_v42  ;;  %582 = vmatpush.bf16.msrb.mxu1 %v394_v43  ;;  %v1145_v42 = vor.u32 %v1282_v38, %v1142_v39  ;;  %v1149_v43 = vor.u32 %v1284_v41, %v1148_v40  ;;  %v837_v38 = vpack.c.bf16 %v822_v35, %v821_v34 }
  0x34   : > { %914 = vmatpush.bf16.msrb.mxu0 %v1314_v6 }
  0x36   : > { %632 = vmatpush.bf16.msrb.mxu2 %v401_v49  ;;  %583 = vmatpush.bf16.msrb.mxu1 %v393_v50  ;;  %v1161_v49 = vor.u32 %v1287_v47, %v1160_v46  ;;  %v1188_v50 = vld [vmem:[%s1457_s14 + $0x90] sm:$0xf]  ;;  %v838_v46 = vpack.c.bf16 %v824_v45, %v823_v44  ;;  %v834_v45 = vld [vmem:[%s1660_s20 + $0x68] sm:$0xff] }
  0x37   : > { %v1189_v52 = vor.u32 %v1295_v51, %v1188_v50 }
  0x39   : > { %570 = vmatmul.bf16.vlgmr.msra.gmra.mxu3 %v1189_v52 }
  0x3a   : > { %633 = vmatpush.bf16.msrb.mxu2 %v400_v55  ;;  %584 = vmatpush.bf16.msrb.mxu1 %v392_v56  ;;  %v1172_v55 = vld [vmem:[%s1457_s14 + $0x68] sm:$0xf]  ;;  %v1290_v56 = vld [vmem:[%s1457_s14 + $0x70] sm:$0xf0] }
  0x3b   : > { %v1173_v58 = vor.u32 %v1290_v56, %v1172_v55  ;;  %v826_v55 = vld [vmem:[%s1660_s20 + $0x28] sm:$0xff] }
  0x3d   : > { %555 = vmatmul.bf16.gmra.mxu1 %v1153_v7  ;;  %565 = vmatmul.bf16.gmra.mxu2 %v1177_v8  ;;  %v1306_v7 = vld [vmem:[%s1792_s2 + $0x30] sm:$0xff]  ;;  %v1313_v8 = vld [vmem:[%s1794_s4 + $0x28] sm:$0xff] }
  0x3e   : > { %634 = vmatpush.bf16.msrb.mxu2 %v399_v1  ;;  %585 = vmatpush.bf16.msrb.mxu1 %v391_v2  ;;  %v1293_v1 = vld [vmem:[%s1457_s14 + $0x88] sm:$0xf0]  ;;  %v1181_v2 = vor.u32 %v1291_v62, %v1178_v63 }
  0x3f   : > { %545 = vmatmul.bf16.gmra.mxu0 %v1129_v17  ;;  %v1185_v3 = vor.u32 %v1293_v1, %v1184_v0  ;;  %756 = vmatpush.bf16.msrb.mxu3 %v1306_v7 }
  0x40   : > { %915 = vmatpush.bf16.msrb.mxu0 %v1313_v8  ;;  %v840_v8 = vpack.c.bf16 %v828_v5, %v827_v4 }
  0x42   : > { %635 = vmatpush.bf16.msrb.mxu2 %v398_v11  ;;  %586 = vmatpush.bf16.msrb.mxu1 %v390_v12  ;;  %v1190_v11 = vld [vmem:[%s1457_s14 + $0x9c] sm:$0xf0]  ;;  %v1196_v12 = vld [vmem:[%s1457_s14 + $0x98] sm:$0xf] }
  0x43   : > { %757 = vmatpush.bf16.msrb.mxu3 %v1305_v9  ;;  %v1193_v16 = vor.u32 %v1294_v10, %v1190_v11  ;;  %v1197_v17 = vor.u32 %v1296_v13, %v1196_v12 }
  0x44   : > { %916 = vmatpush.bf16.msrb.mxu0 %v1312_v14 }
  0x46   : > { %636 = vmatpush.bf16.msrb.mxu2 %v397_v18  ;;  %587 = vmatpush.bf16.msrb.mxu1 %v389_v19  ;;  %v1311_v19 = vld [vmem:[%s1794_s4 + $0x18] sm:$0xff] }
  0x47   : > { %758 = vmatpush.bf16.msrb.mxu3 %v1304_v15 }
  0x48   : > { %917 = vmatpush.bf16.msrb.mxu0 %v1311_v19 }
  0x49   : > { %575 = vmatmul.bf16.gmra.mxu3 %v1201_v61 }
  0x4a   : > { %637 = vmatpush.bf16.msrb.mxu2 %v396_v24  ;;  %588 = vmatpush.bf16.msrb.mxu1 %v388_v25  ;;  %v1309_v25 = vld [vmem:[%s1794_s4 + $0x8] sm:$0xff] }
  0x4b   : > { %759 = vmatpush.bf16.msrb.mxu3 %v1303_v20 }
  0x4c   : > { %918 = vmatpush.bf16.msrb.mxu0 %v1310_v21 }
  0x4d   : > { %589 = vmatmul.bf16.vlgmr.msrb.gmra.mxu1 %v1121_v30  ;;  %638 = vmatmul.bf16.vlgmr.msrb.gmra.mxu2 %v1125_v31  ;;  %v1299_v30 = vld [vmem:[%s1457_s14 + $0xb8] sm:$0xf0]  ;;  %v1308_v31 = vld [vmem:[%s1794_s4] sm:$0xff] }
  0x4f   : > { %760 = vmatpush.bf16.msrb.mxu3 %v1302_v23 }
  0x50   : > { %919 = vmatpush.bf16.msrb.mxu0 %v1309_v25 }
  0x53   : > { %761 = vmatpush.bf16.msrb.mxu3 %v1301_v26 }
  0x54   : > { %920 = vmatpush.bf16.msrb.mxu0 %v1308_v31 }
  0x57   : > { %762 = vmatpush.bf16.msrb.mxu3 %v1300_v33  ;;  %921 = vmatmul.bf16.vlgmr.msrb.gmra.mxu0 %v837_v38 }
  0x5d   : > { %594 = vmatmul.bf16.gmra.mxu1 %v1133_v36  ;;  %643 = vmatmul.bf16.gmra.mxu2 %v1137_v37  ;;  %v1205_v36 = vor.u32 %v1297_v27, %v1202_v28  ;;  %v1209_v37 = vor.u32 %v1299_v30, %v1208_v29  ;;  %v832_v30 = vld [vmem:[%s1660_s20 + $0x58] sm:$0xff] }
  0x67   : > { %926 = vmatmul.bf16.gmra.mxu0 %v838_v46 }
  0x6d   : > { %599 = vmatmul.bf16.gmra.mxu1 %v1145_v42  ;;  %648 = vmatmul.bf16.gmra.mxu2 %v1149_v43 }
  0x7d   : > { %604 = vmatmul.bf16.gmra.mxu1 %v1157_v48  ;;  %653 = vmatmul.bf16.gmra.mxu2 %v1161_v49 }
  0x8d   : > { %609 = vmatmul.bf16.gmra.mxu1 %v1169_v57  ;;  %658 = vmatmul.bf16.gmra.mxu2 %v1173_v58  ;;  %v839_v58 = vpack.c.bf16 %v826_v55, %v825_v54  ;;  %v835_v55 = vld [vmem:[%s1660_s20 + $0x70] sm:$0xff] }
  0x8f   : > { %931 = vmatmul.bf16.gmra.mxu0 %v839_v58 }
  0x9d   : > { %614 = vmatmul.bf16.gmra.mxu1 %v1181_v2  ;;  %663 = vmatmul.bf16.gmra.mxu2 %v1185_v3 }
  0x9f   : > { %936 = vmatmul.bf16.gmra.mxu0 %v840_v8 }
  0xaa   : > { %v1629_v18 = vpop.f32.mrf.mxu1 }
  0xac   : > { %v541_v42 = vpop.f32.mrf.mxu0 }
  0xad   : > { %619 = vmatmul.bf16.gmra.mxu1 %v1193_v16  ;;  %668 = vmatmul.bf16.gmra.mxu2 %v1197_v17  ;;  %v829_v16 = vld [vmem:[%s1660_s20 + $0x40] sm:$0xff]  ;;  %v830_v17 = vld [vmem:[%s1660_s20 + $0x48] sm:$0xff] }
  0xae   : > { %v841_v21 = vpack.c.bf16 %v830_v17, %v829_v16 }
  0xb0   : > { %v1640_v22 = vpop.f32.mrf.mxu2  ;;  %941 = vmatmul.bf16.gmra.mxu0 %v841_v21 }
  0xb2   : > { %v1645_v24 = vpop.f32.mrf.mxu1 }
  0xb4   : > { %v543_v49 = vpop.f32.mrf.mxu0 }
  0xb8   : > { %v1667_v32 = vpop.f32.mrf.mxu2 }
  0xba   : > { %v556_v39 = vpop.f32.mrf.mxu1 }
  0xbc   : > { %v546_v61 = vpop.f32.mrf.mxu0  ;;  %v571_v54 = vpop.f32.mrf.mxu3 }
  0xbd   : > { %624 = vmatmul.bf16.gmra.mxu1 %v1205_v36  ;;  %673 = vmatmul.bf16.gmra.mxu2 %v1209_v37 }
  0xc0   : > { %v1674_v40 = vpop.f32.mrf.mxu2 }
  0xc2   : > { %v558_v41 = vpop.f32.mrf.mxu1 }
  0xc4   : > { %v548_v1 = vpop.f32.mrf.mxu0 }
  0xc8   : > { %v1676_v43 = vpop.f32.mrf.mxu2 }
  0xca   : > { %v590_v47 = vpop.f32.mrf.mxu1 }
  0xcb   : > { %v591_v51 = vadd.f32 %v590_v47, %v541_v42 }
  0xd0   : > { %v639_v48 = vpop.f32.mrf.mxu2 }
  0xd1   : > { %v640_v56 = vadd.f32 %v639_v48, %v591_v51 }
  0xd2   : > { %v592_v50 = vpop.f32.mrf.mxu1 }
  0xd3   : > { %v593_v52 = vadd.f32 %v592_v50, %v543_v49 }
  0xd8   : > { %v641_v53 = vpop.f32.mrf.mxu2 }
  0xd9   : > { %v642_v57 = vadd.f32 %v641_v53, %v593_v52 }
  0xda   : > { %v595_v59 = vpop.f32.mrf.mxu1 }
  0xdb   : > { %v679_v60 = vpack.c.bf16 %v642_v57, %v640_v56  ;;  %v596_v0 = vadd.f32 %v595_v59, %v546_v61  ;;  %v836_v56 = vld [vmem:[%s1660_s20 + $0x78] sm:$0xff] }
  0xdc   : > { %v844_v59 = vpack.c.bf16 %v836_v56, %v835_v55 }
  0xdd   : > { %763 = vmatmul.bf16.vlgmr.msrb.gmra.mxu3 %v679_v60 }
  0xe0   : > { %v644_v62 = vpop.f32.mrf.mxu2 }
  0xe1   : > { %v645_v6 = vadd.f32 %v644_v62, %v596_v0 }
  0xe2   : > { %v597_v63 = vpop.f32.mrf.mxu1 }
  0xe3   : > { %v598_v2 = vadd.f32 %v597_v63, %v548_v1  ;;  %v573_v63 = vpop.f32.mrf.mxu3 }
  0xe8   : > { %v646_v3 = vpop.f32.mrf.mxu2 }
  0xe9   : > { %v647_v7 = vadd.f32 %v646_v3, %v598_v2  ;;  %v922_v3 = vpop.f32.mrf.mxu0 }
  0xea   : > { %v600_v9 = vpop.f32.mrf.mxu1 }
  0xeb   : > { %v680_v10 = vpack.c.bf16 %v647_v7, %v645_v6  ;;  %v601_v13 = vadd.f32 %v600_v9, %v1629_v18 }
  0xed   : > { %768 = vmatmul.bf16.gmra.mxu3 %v680_v10  ;;  %v576_v10 = vpop.f32.mrf.mxu3 }
  0xf0   : > { %v649_v11 = vpop.f32.mrf.mxu2 }
  0xf1   : > { %v650_v19 = vadd.f32 %v649_v11, %v601_v13 }
  0xf2   : > { %v602_v12 = vpop.f32.mrf.mxu1 }
  0xf3   : > { %v603_v14 = vadd.f32 %v602_v12, %v1645_v24  ;;  %v831_v24 = vld [vmem:[%s1660_s20 + $0x50] sm:$0xff]  ;;  %v924_v12 = vpop.f32.mrf.mxu0 }
  0xf4   : > { %v842_v34 = vpack.c.bf16 %v832_v30, %v831_v24 }
  0xf5   : > { %v578_v17 = vpop.f32.mrf.mxu3 }
  0xf6   : > { %946 = vmatmul.bf16.gmra.mxu0 %v842_v34 }
  0xf8   : > { %v651_v15 = vpop.f32.mrf.mxu2 }
  0xf9   : > { %v652_v20 = vadd.f32 %v651_v15, %v603_v14 }
  0xfa   : > { %v605_v23 = vpop.f32.mrf.mxu1 }
  0xfb   : > { %v681_v25 = vpack.c.bf16 %v652_v20, %v650_v19  ;;  %v606_v28 = vadd.f32 %v605_v23, %v556_v39  ;;  %v927_v21 = vpop.f32.mrf.mxu0 }
  0xfd   : > { %773 = vmatmul.bf16.gmra.mxu3 %v681_v25 }
 0x100   : > { %v654_v26 = vpop.f32.mrf.mxu2 }
 0x101   : > { %v655_v31 = vadd.f32 %v654_v26, %v606_v28 }
 0x102   : > { %v607_v27 = vpop.f32.mrf.mxu1 }
 0x103   : > { %v608_v29 = vadd.f32 %v607_v27, %v558_v41  ;;  %v833_v41 = vld [vmem:[%s1660_s20 + $0x60] sm:$0xff] }
 0x104   : > { %v843_v48 = vpack.c.bf16 %v834_v45, %v833_v41 }
 0x106   : > { %951 = vmatmul.bf16.gmra.mxu0 %v843_v48 }
 0x108   : > { %v656_v18 = vpop.f32.mrf.mxu2 }
 0x109   : > { %v657_v33 = vadd.f32 %v656_v18, %v608_v29  ;;  %v929_v29 = vpop.f32.mrf.mxu0 }
 0x10a   : > { %v610_v35 = vpop.f32.mrf.mxu1 }
 0x10b   : > { %v682_v36 = vpack.c.bf16 %v657_v33, %v655_v31  ;;  %v611_v42 = vadd.f32 %v610_v35, %v1640_v22  ;;  %v1722_v31 = vld [vmem:[%s1793_s3] ss:$0 sm:$0xff] }
 0x10d   : > { %778 = vmatmul.bf16.gmra.mxu3 %v682_v36 }
 0x110   : > { %v659_v37 = vpop.f32.mrf.mxu2 }
 0x111   : > { %v660_v46 = vadd.f32 %v659_v37, %v611_v42  ;;  %v932_v30 = vpop.f32.mrf.mxu0 }
 0x112   : > { %v612_v38 = vpop.f32.mrf.mxu1 }
 0x113   : > { %v613_v44 = vadd.f32 %v612_v38, %v1667_v32 }
 0x116   : > { %956 = vmatmul.bf16.gmra.mxu0 %v844_v59 }
 0x118   : > { %v661_v39 = vpop.f32.mrf.mxu2 }
 0x119   : > { %v662_v47 = vadd.f32 %v661_v39, %v613_v44  ;;  %v934_v36 = vpop.f32.mrf.mxu0 }
 0x11a   : > { %v615_v49 = vpop.f32.mrf.mxu1 }
 0x11b   : > { %v683_v50 = vpack.c.bf16 %v662_v47, %v660_v46  ;;  %v616_v53 = vadd.f32 %v615_v49, %v1674_v40  ;;  %v1701_v40 = vld [vmem:[%s1795_s5] ss:$0 sm:$0xff] }
 0x11c   : > { %v923_v6 = vadd.f32 %v1701_v40, %v922_v3  ;;  %v925_v13 = vadd.f32 %v1701_v40, %v924_v12  ;;  %v928_v27 = vadd.f32 %v1701_v40, %v927_v21  ;;  %v930_v18 = vadd.f32 %v1701_v40, %v929_v29 }
 0x11d   : > { %783 = vmatmul.bf16.gmra.mxu3 %v683_v50  ;;  %v933_v33 = vadd.f32 %v1701_v40, %v932_v30  ;;  %v935_v38 = vadd.f32 %v1701_v40, %v934_v36 }
 0x11e   : > { %v962_v9 = vmax.f32 %v923_v6, 0.0  ;;  %v963_v14 = vmax.f32 %v925_v13, 0.0  ;;  %v964_v28 = vmax.f32 %v928_v27, 0.0  ;;  %v965_v24 = vmax.f32 %v930_v18, 0.0 }
 0x11f   : > { %v966_v34 = vmax.f32 %v933_v33, 0.0  ;;  %v967_v44 = vmax.f32 %v935_v38, 0.0 }
 0x120   : > { %v664_v51 = vpop.f32.mrf.mxu2  ;;  %978 = vst [vmem:[%s1710_s30] sm:$0xff] %v962_v9 }
 0x121   : > { %v665_v57 = vadd.f32 %v664_v51, %v616_v53  ;;  %979 = vst [vmem:[%s1710_s30 + $0x8] sm:$0xff] %v963_v14  ;;  %v937_v41 = vpop.f32.mrf.mxu0 }
 0x122   : > { %v617_v52 = vpop.f32.mrf.mxu1  ;;  %980 = vst [vmem:[%s1710_s30 + $0x10] sm:$0xff] %v964_v28  ;;  %v938_v47 = vadd.f32 %v1701_v40, %v937_v41 }
 0x123   : > { %v618_v22 = vadd.f32 %v617_v52, %v1676_v43  ;;  %981 = vst [vmem:[%s1710_s30 + $0x18] sm:$0xff] %v965_v24 }
 0x124   : > { %982 = vst [vmem:[%s1710_s30 + $0x20] sm:$0xff] %v966_v34  ;;  %v968_v48 = vmax.f32 %v938_v47, 0.0 }
 0x125   : > { %983 = vst [vmem:[%s1710_s30 + $0x28] sm:$0xff] %v967_v44 }
 0x126   : > { %984 = vst [vmem:[%s1710_s30 + $0x30] sm:$0xff] %v968_v48 }
 0x128   : > { %v666_v32 = vpop.f32.mrf.mxu2 }
 0x129   : > { %v667_v58 = vadd.f32 %v666_v32, %v618_v22  ;;  %v939_v50 = vpop.f32.mrf.mxu0 }
 0x12a   : > { %v620_v60 = vpop.f32.mrf.mxu1  ;;  %v940_v52 = vadd.f32 %v1701_v40, %v939_v50 }
 0x12b   : > { %v684_v61 = vpack.c.bf16 %v667_v58, %v665_v57  ;;  %v621_v1 = vadd.f32 %v620_v60, %v571_v54 }
 0x12c   : > { %v969_v22 = vmax.f32 %v940_v52, 0.0 }
 0x12d   : > { %788 = vmatmul.bf16.gmra.mxu3 %v684_v61 }
 0x12e   : > { %985 = vst [vmem:[%s1710_s30 + $0x38] sm:$0xff] %v969_v22 }
 0x130   : > { %v669_v62 = vpop.f32.mrf.mxu2 }
 0x131   : > { %v670_v4 = vadd.f32 %v669_v62, %v621_v1  ;;  %v942_v32 = vpop.f32.mrf.mxu0 }
 0x132   : > { %v622_v0 = vpop.f32.mrf.mxu1  ;;  %v943_v57 = vadd.f32 %v1701_v40, %v942_v32 }
 0x133   : > { %v623_v43 = vadd.f32 %v622_v0, %v573_v63 }
 0x134   : > { %v970_v58 = vmax.f32 %v943_v57, 0.0 }
 0x136   : > { %986 = vst [vmem:[%s1710_s30 + $0x40] sm:$0xff] %v970_v58 }
 0x138   : > { %v671_v2 = vpop.f32.mrf.mxu2 }
 0x139   : > { %v672_v5 = vadd.f32 %v671_v2, %v623_v43  ;;  %v944_v60 = vpop.f32.mrf.mxu0 }
 0x13a   : > { %v625_v7 = vpop.f32.mrf.mxu1  ;;  %v945_v62 = vadd.f32 %v1701_v40, %v944_v60 }
 0x13b   : > { %v685_v8 = vpack.c.bf16 %v672_v5, %v670_v4  ;;  %v626_v16 = vadd.f32 %v625_v7, %v576_v10 }
 0x13c   : > { %v971_v0 = vmax.f32 %v945_v62, 0.0 }
 0x13d   : > { %793 = vmatmul.bf16.gmra.mxu3 %v685_v8 }
 0x13e   : > { %987 = vst [vmem:[%s1710_s30 + $0x48] sm:$0xff] %v971_v0 }
 0x140   : > { %v674_v11 = vpop.f32.mrf.mxu2 }
 0x141   : > { %v675_v23 = vadd.f32 %v674_v11, %v626_v16 }
 0x142   : > { %v627_v15 = vpop.f32.mrf.mxu1 }
 0x143   : > { %v628_v19 = vadd.f32 %v627_v15, %v578_v17 }
 0x148   : > { %v676_v20 = vpop.f32.mrf.mxu2 }
 0x149   : > { %v677_v25 = vadd.f32 %v676_v20, %v628_v19 }
 0x14b   : > { %v686_v26 = vpack.c.bf16 %v677_v25, %v675_v23 }
 0x14d   : > { %798 = vmatmul.bf16.gmra.mxu3 %v686_v26 }
 0x160   : > { %v764_v35 = vpop.f32.mrf.mxu3 }
 0x161   : > { %v765_v37 = vadd.f32 %v1722_v31, %v764_v35 }
 0x163   : > { %v804_v42 = vmax.f32 %v765_v37, 0.0 }
 0x165   : > { %994 = vst [vmem:[%s1733_s12] sm:$0xff] %v804_v42 }
 0x168   : > { %v766_v39 = vpop.f32.mrf.mxu3 }
 0x169   : > { %v767_v45 = vadd.f32 %v1722_v31, %v766_v39 }
 0x16b   : > { %v805_v46 = vmax.f32 %v767_v45, 0.0 }
 0x16d   : > { %995 = vst [vmem:[%s1733_s12 + $0x8] sm:$0xff] %v805_v46 }
 0x170   : > { %v769_v49 = vpop.f32.mrf.mxu3 }
 0x171   : > { %v770_v51 = vadd.f32 %v1722_v31, %v769_v49 }
 0x173   : > { %v806_v53 = vmax.f32 %v770_v51, 0.0  ;;  %v947_v43 = vpop.f32.mrf.mxu0 }
 0x174   : > { %v948_v4 = vadd.f32 %v1701_v40, %v947_v43 }
 0x175   : > { %996 = vst [vmem:[%s1733_s12 + $0x10] sm:$0xff] %v806_v53 }
 0x176   : > { %v972_v5 = vmax.f32 %v948_v4, 0.0 }
 0x178   : > { %v771_v54 = vpop.f32.mrf.mxu3  ;;  %988 = vst [vmem:[%s1710_s30 + $0x50] sm:$0xff] %v972_v5 }
 0x179   : > { %v772_v55 = vadd.f32 %v1722_v31, %v771_v54 }
 0x17b   : > { %v807_v56 = vmax.f32 %v772_v55, 0.0  ;;  %v949_v7 = vpop.f32.mrf.mxu0 }
 0x17c   : > { %v950_v9 = vadd.f32 %v1701_v40, %v949_v7 }
 0x17d   : > { %997 = vst [vmem:[%s1733_s12 + $0x18] sm:$0xff] %v807_v56 }
 0x17e   : > { %v973_v11 = vmax.f32 %v950_v9, 0.0 }
 0x180   : > { %v774_v59 = vpop.f32.mrf.mxu3  ;;  %989 = vst [vmem:[%s1710_s30 + $0x58] sm:$0xff] %v973_v11 }
 0x181   : > { %v775_v61 = vadd.f32 %v1722_v31, %v774_v59 }
 0x183   : > { %v808_v63 = vmax.f32 %v775_v61, 0.0  ;;  %v952_v13 = vpop.f32.mrf.mxu0 }
 0x184   : > { %v953_v16 = vadd.f32 %v1701_v40, %v952_v13 }
 0x185   : > { %998 = vst [vmem:[%s1733_s12 + $0x20] sm:$0xff] %v808_v63 }
 0x186   : > { %v974_v17 = vmax.f32 %v953_v16, 0.0 }
 0x188   : > { %v776_v1 = vpop.f32.mrf.mxu3  ;;  %990 = vst [vmem:[%s1710_s30 + $0x60] sm:$0xff] %v974_v17 }
 0x189   : > { %v777_v2 = vadd.f32 %v1722_v31, %v776_v1 }
 0x18b   : > { %v809_v3 = vmax.f32 %v777_v2, 0.0  ;;  %v954_v20 = vpop.f32.mrf.mxu0 }
 0x18c   : > { %v955_v23 = vadd.f32 %v1701_v40, %v954_v20 }
 0x18d   : > { %999 = vst [vmem:[%s1733_s12 + $0x28] sm:$0xff] %v809_v3 }
 0x18e   : > { %v975_v26 = vmax.f32 %v955_v23, 0.0 }
 0x190   : > { %v779_v6 = vpop.f32.mrf.mxu3  ;;  %991 = vst [vmem:[%s1710_s30 + $0x68] sm:$0xff] %v975_v26 }
 0x191   : > { %v780_v8 = vadd.f32 %v1722_v31, %v779_v6 }
 0x193   : > { %v810_v10 = vmax.f32 %v780_v8, 0.0  ;;  %v957_v28 = vpop.f32.mrf.mxu0 }
 0x194   : > { %v958_v24 = vadd.f32 %v1701_v40, %v957_v28 }
 0x195   : > { %1000 = vst [vmem:[%s1733_s12 + $0x30] sm:$0xff] %v810_v10 }
 0x196   : > { %v976_v30 = vmax.f32 %v958_v24, 0.0 }
 0x198   : > { %v781_v12 = vpop.f32.mrf.mxu3  ;;  %992 = vst [vmem:[%s1710_s30 + $0x70] sm:$0xff] %v976_v30 }
 0x199   : > { %v782_v14 = vadd.f32 %v1722_v31, %v781_v12 }
 0x19b   : > { %v811_v15 = vmax.f32 %v782_v14, 0.0  ;;  %v959_v34 = vpop.f32.mrf.mxu0 }
 0x19c   : > { %v960_v36 = vadd.f32 %v1701_v40, %v959_v34 }
 0x19d   : > { %1001 = vst [vmem:[%s1733_s12 + $0x38] sm:$0xff] %v811_v15 }
 0x19e   : > { %v977_v38 = vmax.f32 %v960_v36, 0.0 }
 0x1a0   : > { %v784_v19 = vpop.f32.mrf.mxu3  ;;  %993 = vst [vmem:[%s1710_s30 + $0x78] sm:$0xff] %v977_v38 }
 0x1a1   : > { %v785_v21 = vadd.f32 %v1722_v31, %v784_v19 }
 0x1a3   : > { %v812_v25 = vmax.f32 %v785_v21, 0.0 }
 0x1a5   : > { %1002 = vst [vmem:[%s1733_s12 + $0x40] sm:$0xff] %v812_v25 }
 0x1a8   : > { %v786_v27 = vpop.f32.mrf.mxu3 }
 0x1a9   : > { %v787_v29 = vadd.f32 %v1722_v31, %v786_v27 }
 0x1ab   : > { %v813_v18 = vmax.f32 %v787_v29, 0.0 }
 0x1ad   : > { %1003 = vst [vmem:[%s1733_s12 + $0x48] sm:$0xff] %v813_v18 }
 0x1b0   : > { %v789_v33 = vpop.f32.mrf.mxu3 }
 0x1b1   : > { %v790_v35 = vadd.f32 %v1722_v31, %v789_v33 }
 0x1b3   : > { %v814_v37 = vmax.f32 %v790_v35, 0.0 }
 0x1b5   : > { %1004 = vst [vmem:[%s1733_s12 + $0x50] sm:$0xff] %v814_v37 }
 0x1b8   : > { %v791_v42 = vpop.f32.mrf.mxu3 }
 0x1b9   : > { %v792_v44 = vadd.f32 %v1722_v31, %v791_v42 }
 0x1bb   : > { %v815_v39 = vmax.f32 %v792_v44, 0.0 }
 0x1bd   : > { %1005 = vst [vmem:[%s1733_s12 + $0x58] sm:$0xff] %v815_v39 }
 0x1c0   : > { %v794_v41 = vpop.f32.mrf.mxu3 }
 0x1c1   : > { %v795_v45 = vadd.f32 %v1722_v31, %v794_v41 }
 0x1c3   : > { %v816_v46 = vmax.f32 %v795_v45, 0.0 }
 0x1c5   : > { %1006 = vst [vmem:[%s1733_s12 + $0x60] sm:$0xff] %v816_v46 }
 0x1c8   : > { %v796_v47 = vpop.f32.mrf.mxu3 }
 0x1c9   : > { %v797_v40 = vadd.f32 %v1722_v31, %v796_v47 }
 0x1cb   : > { %v817_v48 = vmax.f32 %v797_v40, 0.0 }
 0x1cd   : > { %1007 = vst [vmem:[%s1733_s12 + $0x68] sm:$0xff] %v817_v48 }
 0x1d0   : > { %v799_v49 = vpop.f32.mrf.mxu3 }
 0x1d1   : > { %v800_v50 = vadd.f32 %v1722_v31, %v799_v49 }
 0x1d3   : > { %v818_v51 = vmax.f32 %v800_v50, 0.0 }
 0x1d5   : > { %1008 = vst [vmem:[%s1733_s12 + $0x70] sm:$0xff] %v818_v51 }
 0x1d8   : > { %v801_v52 = vpop.f32.mrf.mxu3 }
 0x1d9   : > { %v802_v53 = vadd.f32 %v1722_v31, %v801_v52 }
 0x1db   : > { %v819_v22 = vmax.f32 %v802_v53, 0.0 }
 0x1dd   : > { %1009 = vst [vmem:[%s1733_s12 + $0x78] sm:$0xff] %v819_v22 }
 0x1de PF: > { %s18_s24 = sadd.s32 1, %s1357_s24  }
 0x1df   : > { %p15_p4 = scmp.ge.s32.totalorder %s18_s24, 5  }
 0x1e1   :  { %17 = sbr.rel (!%p15_p4) target bundleno = 1 (0x1), region = 87 }

</bundles_post_ra>
